<compile_context>
chip_gen: v7x
topology: tpu7x:2x2x1
jax: 0.10.0
libtpu: 0.0.40
codegen_flags: <defaults>
</compile_context>

<pallas_src>
import functools

import numpy as np
import jax
import jax.numpy as jnp
from jax.experimental import pallas as pl
from jax.experimental.pallas import tpu as pltpu


# ---------------------------------------------------------------------------
# Pallas kernel: one (plane-group, Hh-tile) step per grid point
# ---------------------------------------------------------------------------
def _guided_filter_kernel(p_ref, i_ref, ihr_ref, sh_ref, swt_ref,
                          uh_ref, uwt_ref, out_ref, abw_ref, *, eps):
    K, Hl, Wl = i_ref.shape
    THh, Wh = out_ref.shape[1], out_ref.shape[2]

    # ---- low-res statistics + upsample W-pass: once per plane group -------
    @pl.when(pl.program_id(1) == 0)
    def _():
        I = i_ref[...]                                   # (K, Hl, Wl)
        p = p_ref[...]
        # Elementwise products on the full block, ONE leading-dim concat
        # (no per-plane concatenates / underfilled vregs).
        S = jnp.concatenate([I, p, I * p, I * I], axis=0)          # (4K,Hl,Wl)

        # Clamped box filter; 1/count is folded into the constants (exact,
        # since count = outer(cnt_h, cnt_w)).
        # W pass: one matmul over all 4K planes (no block-diag zeros).
        Yw = jnp.dot(S.reshape(4 * K * Hl, Wl), swt_ref[...],
                     preferred_element_type=jnp.float32)           # (4K*Hl,Wl)
        # H pass: batched contraction over the 4K planes, small ShN constant.
        Yw3 = Yw.reshape(4 * K, Hl, Wl)
        shb = jnp.broadcast_to(sh_ref[...], (4 * K, Hl, Hl))
        Boxed = jnp.einsum('bhm,bmw->bhw', shb, Yw3,
                           preferred_element_type=jnp.float32)     # (4K,Hl,Wl)

        mean_I = Boxed[0 * K:1 * K]
        mean_p = Boxed[1 * K:2 * K]
        mean_Ip = Boxed[2 * K:3 * K]
        mean_II = Boxed[3 * K:4 * K]
        cov_Ip = mean_Ip - mean_I * mean_p
        var_I = mean_II - mean_I * mean_I
        A = cov_Ip / (var_I + eps)               # exact divide (quality)
        B = mean_p - A * mean_I                  # (K, Hl, Wl)

        # Bilinear upsample, W pass only.  Lane-stack the 2K planes into the
        # persistent scratch so every Hh tile's H pass is a single matmul.
        uwt = uwt_ref[...]                                          # (Wl, Wh)
        for k in range(K):
            abw_ref[:, k * Wh:(k + 1) * Wh] = jnp.dot(
                A[k], uwt, preferred_element_type=jnp.float32)
            abw_ref[:, (K + k) * Wh:(K + k + 1) * Wh] = jnp.dot(
                B[k], uwt, preferred_element_type=jnp.float32)

    # ---- upsample H-pass for this Hh tile: ONE lane-dense matmul ----------
    HR = jnp.dot(uh_ref[...], abw_ref[...],
                 preferred_element_type=jnp.float32)                # (THh,2K*Wh)
    for k in range(K):
        a_hr = HR[:, k * Wh:(k + 1) * Wh]
        b_hr = HR[:, (K + k) * Wh:(K + k + 1) * Wh]
        out_ref[k] = (a_hr * ihr_ref[k] + b_hr).astype(out_ref.dtype)


# ---------------------------------------------------------------------------
# Constant-matrix builders (host-side numpy glue, built once)
# ---------------------------------------------------------------------------
def _box_matrix(n, r):
    idx = np.arange(n)
    return (np.abs(idx[:, None] - idx[None, :]) <= r).astype(np.float32)


def _count_vec(n, r):
    idx = np.arange(n)
    lo = np.maximum(idx - r, 0)
    hi = np.minimum(idx + r, n - 1)
    return (hi - lo + 1).astype(np.float32)


def _bilinear_matrix(n_out, n_in):
    # Matches torch.nn.functional.interpolate(mode='bilinear', align_corners=False)
    scale = n_in / n_out
    m = np.zeros((n_out, n_in), np.float32)
    for i in range(n_out):
        src = (i + 0.5) * scale - 0.5
        src = max(src, 0.0)
        i0 = min(int(np.floor(src)), n_in - 1)
        i1 = min(i0 + 1, n_in - 1)
        w1 = src - i0
        m[i, i0] += 1.0 - w1
        m[i, i1] += w1
    return m


def _pick_planes_per_step(n):
    # Largest K in {8,4,2} dividing n that keeps >=2 parallel grid steps.
    for cand in (8, 4, 2):
        if n % cand == 0 and n // cand >= 2:
            return cand
    return 1


def _pick_hh_tile(hh):
    # Largest divisor of Hh that is <=256 and a multiple of 8 (or Hh itself),
    # so hi-res blocks stay small and (8,128)-compatible.
    if hh <= 256:
        return hh
    for d in range(256, 7, -1):
        if hh % d == 0 and d % 8 == 0:
            return d
    return hh


def _vmem_limit_bytes():
    cap = 128 * 1024 * 1024
    try:
        info = pltpu.get_tpu_info()
        cap = int(getattr(info, "vmem_capacity_bytes", cap))
    except Exception:
        pass
    # ~3/4 of physical VMEM: 96 MiB on v5e/v6e, 48 MiB on v7x.
    return int(max(32 * 1024 * 1024, min(96 * 1024 * 1024, cap * 3 // 4)))


def _const_spec(shape):
    zeros = (0,) * len(shape)
    index_map = lambda g, t, _z=zeros: _z
    try:
        return pl.BlockSpec(shape, index_map, pipeline_mode=pl.Buffered(1))
    except TypeError:  # older jax without pipeline_mode: default buffering
        return pl.BlockSpec(shape, index_map)


# ---------------------------------------------------------------------------
# Wrapper
# ---------------------------------------------------------------------------
def fast_guided_filter(p_lr, I_lr, I_hr, radius, eps):
    B, C, Hl, Wl = p_lr.shape
    Hh, Wh = I_hr.shape[2], I_hr.shape[3]
    N = B * C
    K = _pick_planes_per_step(N)
    G = N // K
    THh = _pick_hh_tile(Hh)
    nT = Hh // THh

    # Box-filter constants with 1/count folded in (row/col normalized).
    cnt_h = _count_vec(Hl, radius)
    cnt_w = _count_vec(Wl, radius)
    ShN = jnp.asarray(_box_matrix(Hl, radius) / cnt_h[:, None], jnp.float32)
    SwTN = jnp.asarray(_box_matrix(Wl, radius).T / cnt_w[None, :], jnp.float32)
    Uh = jnp.asarray(_bilinear_matrix(Hh, Hl), jnp.float32)          # (Hh, Hl)
    UwT = jnp.asarray(_bilinear_matrix(Wh, Wl).T, jnp.float32)       # (Wl, Wh)

    p2 = p_lr.reshape(N, Hl, Wl)
    i2 = I_lr.reshape(N, Hl, Wl)
    ih2 = I_hr.reshape(N, Hh, Wh)

    # Advisory cost estimate (kernel is HBM-bound on the hi-res read+write).
    flops = G * (
        2 * (4 * K * Hl) * Wl * Wl          # stats W pass
        + 2 * (4 * K) * Hl * Hl * Wl        # stats H pass (batched)
        + 2 * (2 * K) * Hl * Wl * Wh        # upsample W pass
        + 2 * (2 * K) * Hh * Hl * Wh        # upsample H pass (all tiles)
        + 3 * K * Hh * Wh)                  # final fma
    itemsize_hr = jnp.dtype(I_hr.dtype).itemsize
    bytes_accessed = (4 * 2 * N * Hl * Wl
                      + itemsize_hr * 2 * N * Hh * Wh
                      + 4 * (Hl * Hl + Wl * Wl + Hh * Hl + Wl * Wh))

    kernel = functools.partial(_guided_filter_kernel, eps=float(eps))
    out = pl.pallas_call(
        kernel,
        out_shape=jax.ShapeDtypeStruct((N, Hh, Wh), I_hr.dtype),
        grid_spec=pltpu.PrefetchScalarGridSpec(
            num_scalar_prefetch=0,
            grid=(G, nT),
            in_specs=[
                pl.BlockSpec((K, Hl, Wl), lambda g, t: (g, 0, 0)),    # p_lr
                pl.BlockSpec((K, Hl, Wl), lambda g, t: (g, 0, 0)),    # I_lr
                pl.BlockSpec((K, THh, Wh), lambda g, t: (g, t, 0)),   # I_hr tile
                _const_spec((Hl, Hl)),                                # ShN
                _const_spec((Wl, Wl)),                                # SwTN
                pl.BlockSpec((THh, Hl), lambda g, t: (t, 0)),         # Uh tile
                _const_spec((Wl, Wh)),                                # UwT
            ],
            out_specs=pl.BlockSpec((K, THh, Wh), lambda g, t: (g, t, 0)),
            scratch_shapes=[pltpu.VMEM((Hl, 2 * K * Wh), jnp.float32)],
        ),
        compiler_params=pltpu.CompilerParams(
            dimension_semantics=("parallel", "arbitrary"),
            vmem_limit_bytes=_vmem_limit_bytes()),
        cost_estimate=pl.CostEstimate(
            flops=int(flops),
            transcendentals=int(N * Hl * Wl),
            bytes_accessed=int(bytes_accessed)),
    )(p2, i2, ih2, ShN, SwTN, Uh, UwT)
    return out.reshape(B, C, Hh, Wh)


# ---------------------------------------------------------------------------
# Pure-JAX f32 reference (direct translation of the PyTorch module)
# ---------------------------------------------------------------------------
def _window_sum_ref(x, rh, rw):
    cum_h = jnp.cumsum(x, axis=2)
    wh = 2 * rh + 1
    top = cum_h[..., rh:wh, :]
    midh = cum_h[..., wh:, :] - cum_h[..., :-wh, :]
    bot = cum_h[..., -1:, :] - cum_h[..., -wh:-rh - 1, :]
    out = jnp.concatenate([top, midh, bot], axis=2)
    cum_w = jnp.cumsum(out, axis=3)
    ww = 2 * rw + 1
    left = cum_w[..., rw:ww]
    midw = cum_w[..., ww:] - cum_w[..., :-ww]
    right = cum_w[..., -1:] - cum_w[..., -ww:-rw - 1]
    return jnp.concatenate([left, midw, right], axis=3)


def _box_ref(x, r):
    ones = jnp.ones_like(x)
    return _window_sum_ref(x, r, r) / _window_sum_ref(ones, r, r)


def _bilinear_ref(x, Hh, Wh):
    _, _, Hl, Wl = x.shape
    Uh = jnp.asarray(_bilinear_matrix(Hh, Hl))
    Uw = jnp.asarray(_bilinear_matrix(Wh, Wl))
    return jnp.einsum('ij,bcjk,lk->bcil', Uh, x, Uw)


def _ref_forward(p_lr, I_lr, I_hr, radius, eps):
    Hh, Wh = I_hr.shape[2:]
    mean_I = _box_ref(I_lr, radius)
    mean_p = _box_ref(p_lr, radius)
    cov_Ip = _box_ref(I_lr * p_lr, radius) - mean_I * mean_p
    var_I = _box_ref(I_lr * I_lr, radius) - mean_I ** 2
    A = cov_Ip / (var_I + eps)
    Bc = mean_p - A * mean_I
    return _bilinear_ref(A, Hh, Wh) * I_hr + _bilinear_ref(Bc, Hh, Wh)


# ---------------------------------------------------------------------------
if __name__ == "__main__":
    key = jax.random.PRNGKey(0)
    k1, k2, k3 = jax.random.split(key, 3)
    B, C, Hl, Wl, Hh, Wh = 2, 4, 8, 8, 16, 16
    radius, eps = 2, 1e-2

    p_lr = jax.random.uniform(k1, (B, C, Hl, Wl), jnp.float32)
    I_lr = jax.random.uniform(k2, (B, C, Hl, Wl), jnp.float32)
    I_hr = jax.random.uniform(k3, (B, C, Hh, Wh), jnp.float32)

    out = fast_guided_filter(p_lr, I_lr, I_hr, radius, eps)
    jax.block_until_ready(out)

    ref = _ref_forward(p_lr, I_lr, I_hr, radius, eps)
    assert out.shape == (B, C, Hh, Wh)
    # Whole kernel is f32 with an exact divide, so the tolerance is tight
    # (only matmul-vs-cumsum accumulation-order differences remain).
    np.testing.assert_allclose(np.asarray(out), np.asarray(ref),
                               rtol=1e-4, atol=1e-4)
    print("KERNEL_OK")
</pallas_src>

<mosaic_0001>
module attributes {stable_mosaic.version = 11 : i64} {
  func.func @_guided_filter_kernel(%arg0: i32, %arg1: i32, %arg2: memref<4x8x8xf32, #tpu.memory_space<vmem>>, %arg3: memref<4x8x8xf32, #tpu.memory_space<vmem>>, %arg4: memref<4x16x16xf32, #tpu.memory_space<vmem>>, %arg5: memref<8x8xf32, #tpu.memory_space<vmem>>, %arg6: memref<8x8xf32, #tpu.memory_space<vmem>>, %arg7: memref<16x8xf32, #tpu.memory_space<vmem>>, %arg8: memref<8x16xf32, #tpu.memory_space<vmem>>, %arg9: memref<4x16x16xf32, #tpu.memory_space<vmem>>, %arg10: memref<8x128xf32, #tpu.memory_space<vmem>>) attributes {dimension_semantics = [#tpu.dimension_semantics<parallel>, #tpu.dimension_semantics<arbitrary>], iteration_bounds = array<i64: 2, 1>, scalar_prefetch = 0 : i64, scratch_operands = 1 : i64, tpu.core_type = #tpu.core_type<tc>, window_params = [{transform_indices = @transform_0, window_bounds = array<i64: 4, 8, 8>}, {transform_indices = @transform_1, window_bounds = array<i64: 4, 8, 8>}, {transform_indices = @transform_2, window_bounds = array<i64: 4, 16, 16>}, {pipeline_mode = #tpu.pipeline_mode<synchronous>, transform_indices = @transform_3, window_bounds = array<i64: 8, 8>}, {pipeline_mode = #tpu.pipeline_mode<synchronous>, transform_indices = @transform_4, window_bounds = array<i64: 8, 8>}, {transform_indices = @transform_5, window_bounds = array<i64: 16, 8>}, {pipeline_mode = #tpu.pipeline_mode<synchronous>, transform_indices = @transform_6, window_bounds = array<i64: 8, 16>}, {transform_indices = @transform_7, window_bounds = array<i64: 4, 16, 16>}]} {
    %c0_i32 = arith.constant 0 : i32
    %0 = arith.cmpi eq, %arg1, %c0_i32 : i32
    %1 = arith.extui %0 : i1 to i32
    %c0_i32_0 = arith.constant 0 : i32
    %2 = arith.cmpi ne, %1, %c0_i32_0 : i32
    scf.if %2 {
      %c0_25 = arith.constant 0 : index
      %c0_26 = arith.constant 0 : index
      %c0_27 = arith.constant 0 : index
      %42 = vector.load %arg3[%c0_25, %c0_26, %c0_27] : memref<4x8x8xf32, #tpu.memory_space<vmem>>, vector<4x8x8xf32>
      %c0_28 = arith.constant 0 : index
      %c0_29 = arith.constant 0 : index
      %c0_30 = arith.constant 0 : index
      %43 = vector.load %arg2[%c0_28, %c0_29, %c0_30] : memref<4x8x8xf32, #tpu.memory_space<vmem>>, vector<4x8x8xf32>
      %44 = arith.mulf %42, %43 : vector<4x8x8xf32>
      %45 = arith.mulf %42, %42 : vector<4x8x8xf32>
      %46 = tpu.concatenate %42, %43, %44, %45 in 0 : vector<4x8x8xf32>, vector<4x8x8xf32>, vector<4x8x8xf32>, vector<4x8x8xf32> -> vector<16x8x8xf32>
      %47 = vector.shape_cast %46 : vector<16x8x8xf32> to vector<128x8xf32>
      %c0_31 = arith.constant 0 : index
      %c0_32 = arith.constant 0 : index
      %48 = vector.load %arg6[%c0_31, %c0_32] : memref<8x8xf32, #tpu.memory_space<vmem>>, vector<8x8xf32>
      %cst_33 = arith.constant dense<0.000000e+00> : vector<128x8xf32>
      %49 = tpu.matmul %47, %48, %cst_33 {dimension_numbers = #tpu.dot_dimension_numbers<[1], [0], [0], [1], [0, 0, 1, 1], [], []>} : vector<128x8xf32>, vector<8x8xf32>, vector<128x8xf32> -> vector<128x8xf32>
      %50 = vector.shape_cast %49 : vector<128x8xf32> to vector<16x8x8xf32>
      %c0_34 = arith.constant 0 : index
      %c0_35 = arith.constant 0 : index
      %51 = vector.load %arg5[%c0_34, %c0_35] : memref<8x8xf32, #tpu.memory_space<vmem>>, vector<8x8xf32>
      %52 = vector.shape_cast %51 : vector<8x8xf32> to vector<1x8x8xf32>
      %53 = vector.broadcast %52 : vector<1x8x8xf32> to vector<16x8x8xf32>
      "tpu.trace_start"() <{level = 10 : i32, message = "bhm,bmw->bhw"}> : () -> ()
      %cst_36 = arith.constant dense<0.000000e+00> : vector<16x8x8xf32>
      %54 = tpu.matmul %53, %50, %cst_36 {dimension_numbers = #tpu.dot_dimension_numbers<[2], [1], [1], [2], [0, 0, 0, 1, 1, 2], [0], [0]>} : vector<16x8x8xf32>, vector<16x8x8xf32>, vector<16x8x8xf32> -> vector<16x8x8xf32>
      "tpu.trace_stop"() : () -> ()
      %55 = vector.extract_strided_slice %54 {offsets = [0, 0, 0], sizes = [4, 8, 8], strides = [1, 1, 1]} : vector<16x8x8xf32> to vector<4x8x8xf32>
      %56 = vector.extract_strided_slice %54 {offsets = [4, 0, 0], sizes = [4, 8, 8], strides = [1, 1, 1]} : vector<16x8x8xf32> to vector<4x8x8xf32>
      %57 = vector.extract_strided_slice %54 {offsets = [8, 0, 0], sizes = [4, 8, 8], strides = [1, 1, 1]} : vector<16x8x8xf32> to vector<4x8x8xf32>
      %58 = vector.extract_strided_slice %54 {offsets = [12, 0, 0], sizes = [4, 8, 8], strides = [1, 1, 1]} : vector<16x8x8xf32> to vector<4x8x8xf32>
      %59 = arith.mulf %55, %56 : vector<4x8x8xf32>
      %60 = arith.subf %57, %59 : vector<4x8x8xf32>
      %61 = arith.mulf %55, %55 : vector<4x8x8xf32>
      %62 = arith.subf %58, %61 : vector<4x8x8xf32>
      %cst_37 = arith.constant 0.00999999977 : f32
      %63 = vector.broadcast %cst_37 : f32 to vector<4x8x8xf32>
      %64 = arith.addf %62, %63 : vector<4x8x8xf32>
      %65 = arith.divf %60, %64 : vector<4x8x8xf32>
      %66 = arith.mulf %65, %55 : vector<4x8x8xf32>
      %67 = arith.subf %56, %66 : vector<4x8x8xf32>
      %c0_38 = arith.constant 0 : index
      %c0_39 = arith.constant 0 : index
      %68 = vector.load %arg8[%c0_38, %c0_39] : memref<8x16xf32, #tpu.memory_space<vmem>>, vector<8x16xf32>
      %69 = vector.extract_strided_slice %65 {offsets = [0, 0, 0], sizes = [1, 8, 8], strides = [1, 1, 1]} : vector<4x8x8xf32> to vector<1x8x8xf32>
      %70 = vector.shape_cast %69 : vector<1x8x8xf32> to vector<8x8xf32>
      %cst_40 = arith.constant dense<0.000000e+00> : vector<8x16xf32>
      %71 = tpu.matmul %70, %68, %cst_40 {dimension_numbers = #tpu.dot_dimension_numbers<[1], [0], [0], [1], [0, 0, 1, 1], [], []>} : vector<8x8xf32>, vector<8x16xf32>, vector<8x16xf32> -> vector<8x16xf32>
      %c0_41 = arith.constant 0 : index
      %c0_42 = arith.constant 0 : index
      %72 = vector.load %arg10[%c0_41, %c0_42] : memref<8x128xf32, #tpu.memory_space<vmem>>, vector<8x16xf32>
      tpu.vector_store %arg10[%c0_41, %c0_42], %71 {strides = array<i32>} : memref<8x128xf32, #tpu.memory_space<vmem>>, vector<8x16xf32>,
      %73 = vector.extract_strided_slice %67 {offsets = [0, 0, 0], sizes = [1, 8, 8], strides = [1, 1, 1]} : vector<4x8x8xf32> to vector<1x8x8xf32>
      %74 = vector.shape_cast %73 : vector<1x8x8xf32> to vector<8x8xf32>
      %cst_43 = arith.constant dense<0.000000e+00> : vector<8x16xf32>
      %75 = tpu.matmul %74, %68, %cst_43 {dimension_numbers = #tpu.dot_dimension_numbers<[1], [0], [0], [1], [0, 0, 1, 1], [], []>} : vector<8x8xf32>, vector<8x16xf32>, vector<8x16xf32> -> vector<8x16xf32>
      %c0_44 = arith.constant 0 : index
      %c64 = arith.constant 64 : index
      %76 = vector.load %arg10[%c0_44, %c64] : memref<8x128xf32, #tpu.memory_space<vmem>>, vector<8x16xf32>
      tpu.vector_store %arg10[%c0_44, %c64], %75 {strides = array<i32>} : memref<8x128xf32, #tpu.memory_space<vmem>>, vector<8x16xf32>,
      %77 = vector.extract_strided_slice %65 {offsets = [1, 0, 0], sizes = [1, 8, 8], strides = [1, 1, 1]} : vector<4x8x8xf32> to vector<1x8x8xf32>
      %78 = vector.shape_cast %77 : vector<1x8x8xf32> to vector<8x8xf32>
      %cst_45 = arith.constant dense<0.000000e+00> : vector<8x16xf32>
      %79 = tpu.matmul %78, %68, %cst_45 {dimension_numbers = #tpu.dot_dimension_numbers<[1], [0], [0], [1], [0, 0, 1, 1], [], []>} : vector<8x8xf32>, vector<8x16xf32>, vector<8x16xf32> -> vector<8x16xf32>
      %c0_46 = arith.constant 0 : index
      %c16 = arith.constant 16 : index
      %80 = vector.load %arg10[%c0_46, %c16] : memref<8x128xf32, #tpu.memory_space<vmem>>, vector<8x16xf32>
      tpu.vector_store %arg10[%c0_46, %c16], %79 {strides = array<i32>} : memref<8x128xf32, #tpu.memory_space<vmem>>, vector<8x16xf32>,
      %81 = vector.extract_strided_slice %67 {offsets = [1, 0, 0], sizes = [1, 8, 8], strides = [1, 1, 1]} : vector<4x8x8xf32> to vector<1x8x8xf32>
      %82 = vector.shape_cast %81 : vector<1x8x8xf32> to vector<8x8xf32>
      %cst_47 = arith.constant dense<0.000000e+00> : vector<8x16xf32>
      %83 = tpu.matmul %82, %68, %cst_47 {dimension_numbers = #tpu.dot_dimension_numbers<[1], [0], [0], [1], [0, 0, 1, 1], [], []>} : vector<8x8xf32>, vector<8x16xf32>, vector<8x16xf32> -> vector<8x16xf32>
      %c0_48 = arith.constant 0 : index
      %c80 = arith.constant 80 : index
      %84 = vector.load %arg10[%c0_48, %c80] : memref<8x128xf32, #tpu.memory_space<vmem>>, vector<8x16xf32>
      tpu.vector_store %arg10[%c0_48, %c80], %83 {strides = array<i32>} : memref<8x128xf32, #tpu.memory_space<vmem>>, vector<8x16xf32>,
      %85 = vector.extract_strided_slice %65 {offsets = [2, 0, 0], sizes = [1, 8, 8], strides = [1, 1, 1]} : vector<4x8x8xf32> to vector<1x8x8xf32>
      %86 = vector.shape_cast %85 : vector<1x8x8xf32> to vector<8x8xf32>
      %cst_49 = arith.constant dense<0.000000e+00> : vector<8x16xf32>
      %87 = tpu.matmul %86, %68, %cst_49 {dimension_numbers = #tpu.dot_dimension_numbers<[1], [0], [0], [1], [0, 0, 1, 1], [], []>} : vector<8x8xf32>, vector<8x16xf32>, vector<8x16xf32> -> vector<8x16xf32>
      %c0_50 = arith.constant 0 : index
      %c32 = arith.constant 32 : index
      %88 = vector.load %arg10[%c0_50, %c32] : memref<8x128xf32, #tpu.memory_space<vmem>>, vector<8x16xf32>
      tpu.vector_store %arg10[%c0_50, %c32], %87 {strides = array<i32>} : memref<8x128xf32, #tpu.memory_space<vmem>>, vector<8x16xf32>,
      %89 = vector.extract_strided_slice %67 {offsets = [2, 0, 0], sizes = [1, 8, 8], strides = [1, 1, 1]} : vector<4x8x8xf32> to vector<1x8x8xf32>
      %90 = vector.shape_cast %89 : vector<1x8x8xf32> to vector<8x8xf32>
      %cst_51 = arith.constant dense<0.000000e+00> : vector<8x16xf32>
      %91 = tpu.matmul %90, %68, %cst_51 {dimension_numbers = #tpu.dot_dimension_numbers<[1], [0], [0], [1], [0, 0, 1, 1], [], []>} : vector<8x8xf32>, vector<8x16xf32>, vector<8x16xf32> -> vector<8x16xf32>
      %c0_52 = arith.constant 0 : index
      %c96 = arith.constant 96 : index
      %92 = vector.load %arg10[%c0_52, %c96] : memref<8x128xf32, #tpu.memory_space<vmem>>, vector<8x16xf32>
      tpu.vector_store %arg10[%c0_52, %c96], %91 {strides = array<i32>} : memref<8x128xf32, #tpu.memory_space<vmem>>, vector<8x16xf32>,
      %93 = vector.extract_strided_slice %65 {offsets = [3, 0, 0], sizes = [1, 8, 8], strides = [1, 1, 1]} : vector<4x8x8xf32> to vector<1x8x8xf32>
      %94 = vector.shape_cast %93 : vector<1x8x8xf32> to vector<8x8xf32>
      %cst_53 = arith.constant dense<0.000000e+00> : vector<8x16xf32>
      %95 = tpu.matmul %94, %68, %cst_53 {dimension_numbers = #tpu.dot_dimension_numbers<[1], [0], [0], [1], [0, 0, 1, 1], [], []>} : vector<8x8xf32>, vector<8x16xf32>, vector<8x16xf32> -> vector<8x16xf32>
      %c0_54 = arith.constant 0 : index
      %c48 = arith.constant 48 : index
      %96 = vector.load %arg10[%c0_54, %c48] : memref<8x128xf32, #tpu.memory_space<vmem>>, vector<8x16xf32>
      tpu.vector_store %arg10[%c0_54, %c48], %95 {strides = array<i32>} : memref<8x128xf32, #tpu.memory_space<vmem>>, vector<8x16xf32>,
      %97 = vector.extract_strided_slice %67 {offsets = [3, 0, 0], sizes = [1, 8, 8], strides = [1, 1, 1]} : vector<4x8x8xf32> to vector<1x8x8xf32>
      %98 = vector.shape_cast %97 : vector<1x8x8xf32> to vector<8x8xf32>
      %cst_55 = arith.constant dense<0.000000e+00> : vector<8x16xf32>
      %99 = tpu.matmul %98, %68, %cst_55 {dimension_numbers = #tpu.dot_dimension_numbers<[1], [0], [0], [1], [0, 0, 1, 1], [], []>} : vector<8x8xf32>, vector<8x16xf32>, vector<8x16xf32> -> vector<8x16xf32>
      %c0_56 = arith.constant 0 : index
      %c112 = arith.constant 112 : index
      %100 = vector.load %arg10[%c0_56, %c112] : memref<8x128xf32, #tpu.memory_space<vmem>>, vector<8x16xf32>
      tpu.vector_store %arg10[%c0_56, %c112], %99 {strides = array<i32>} : memref<8x128xf32, #tpu.memory_space<vmem>>, vector<8x16xf32>,
    } else {
    }
    %c0 = arith.constant 0 : index
    %c0_1 = arith.constant 0 : index
    %3 = vector.load %arg7[%c0, %c0_1] : memref<16x8xf32, #tpu.memory_space<vmem>>, vector<16x8xf32>
    %c0_2 = arith.constant 0 : index
    %c0_3 = arith.constant 0 : index
    %4 = vector.load %arg10[%c0_2, %c0_3] : memref<8x128xf32, #tpu.memory_space<vmem>>, vector<8x128xf32>
    %cst = arith.constant dense<0.000000e+00> : vector<16x128xf32>
    %5 = tpu.matmul %3, %4, %cst {dimension_numbers = #tpu.dot_dimension_numbers<[1], [0], [0], [1], [0, 0, 1, 1], [], []>} : vector<16x8xf32>, vector<8x128xf32>, vector<16x128xf32> -> vector<16x128xf32>
    %6 = vector.extract_strided_slice %5 {offsets = [0, 0], sizes = [16, 16], strides = [1, 1]} : vector<16x128xf32> to vector<16x16xf32>
    %7 = vector.extract_strided_slice %5 {offsets = [0, 64], sizes = [16, 16], strides = [1, 1]} : vector<16x128xf32> to vector<16x16xf32>
    %c0_4 = arith.constant 0 : index
    %c0_5 = arith.constant 0 : index
    %c0_6 = arith.constant 0 : index
    %8 = vector.load %arg4[%c0_4, %c0_5, %c0_6] : memref<4x16x16xf32, #tpu.memory_space<vmem>>, vector<1x16x16xf32>
    %9 = vector.shape_cast %8 : vector<1x16x16xf32> to vector<16x16xf32>
    %10 = arith.mulf %6, %9 : vector<16x16xf32>
    %11 = arith.addf %10, %7 : vector<16x16xf32>
    %c0_7 = arith.constant 0 : index
    %c0_8 = arith.constant 0 : index
    %c0_9 = arith.constant 0 : index
    %12 = vector.load %arg9[%c0_7, %c0_8, %c0_9] : memref<4x16x16xf32, #tpu.memory_space<vmem>>, vector<1x16x16xf32>
    %13 = vector.shape_cast %12 : vector<1x16x16xf32> to vector<16x16xf32>
    %14 = vector.shape_cast %11 : vector<16x16xf32> to vector<1x16x16xf32>
    tpu.vector_store %arg9[%c0_7, %c0_8, %c0_9], %14 {strides = array<i32>} : memref<4x16x16xf32, #tpu.memory_space<vmem>>, vector<1x16x16xf32>,
    %15 = vector.extract_strided_slice %5 {offsets = [0, 16], sizes = [16, 16], strides = [1, 1]} : vector<16x128xf32> to vector<16x16xf32>
    %16 = vector.extract_strided_slice %5 {offsets = [0, 80], sizes = [16, 16], strides = [1, 1]} : vector<16x128xf32> to vector<16x16xf32>
    %c1 = arith.constant 1 : index
    %c0_10 = arith.constant 0 : index
    %c0_11 = arith.constant 0 : index
    %17 = vector.load %arg4[%c1, %c0_10, %c0_11] : memref<4x16x16xf32, #tpu.memory_space<vmem>>, vector<1x16x16xf32>
    %18 = vector.shape_cast %17 : vector<1x16x16xf32> to vector<16x16xf32>
    %19 = arith.mulf %15, %18 : vector<16x16xf32>
    %20 = arith.addf %19, %16 : vector<16x16xf32>
    %c1_12 = arith.constant 1 : index
    %c0_13 = arith.constant 0 : index
    %c0_14 = arith.constant 0 : index
    %21 = vector.load %arg9[%c1_12, %c0_13, %c0_14] : memref<4x16x16xf32, #tpu.memory_space<vmem>>, vector<1x16x16xf32>
    %22 = vector.shape_cast %21 : vector<1x16x16xf32> to vector<16x16xf32>
    %23 = vector.shape_cast %20 : vector<16x16xf32> to vector<1x16x16xf32>
    tpu.vector_store %arg9[%c1_12, %c0_13, %c0_14], %23 {strides = array<i32>} : memref<4x16x16xf32, #tpu.memory_space<vmem>>, vector<1x16x16xf32>,
    %24 = vector.extract_strided_slice %5 {offsets = [0, 32], sizes = [16, 16], strides = [1, 1]} : vector<16x128xf32> to vector<16x16xf32>
    %25 = vector.extract_strided_slice %5 {offsets = [0, 96], sizes = [16, 16], strides = [1, 1]} : vector<16x128xf32> to vector<16x16xf32>
    %c2 = arith.constant 2 : index
    %c0_15 = arith.constant 0 : index
    %c0_16 = arith.constant 0 : index
    %26 = vector.load %arg4[%c2, %c0_15, %c0_16] : memref<4x16x16xf32, #tpu.memory_space<vmem>>, vector<1x16x16xf32>
    %27 = vector.shape_cast %26 : vector<1x16x16xf32> to vector<16x16xf32>
    %28 = arith.mulf %24, %27 : vector<16x16xf32>
    %29 = arith.addf %28, %25 : vector<16x16xf32>
    %c2_17 = arith.constant 2 : index
    %c0_18 = arith.constant 0 : index
    %c0_19 = arith.constant 0 : index
    %30 = vector.load %arg9[%c2_17, %c0_18, %c0_19] : memref<4x16x16xf32, #tpu.memory_space<vmem>>, vector<1x16x16xf32>
    %31 = vector.shape_cast %30 : vector<1x16x16xf32> to vector<16x16xf32>
    %32 = vector.shape_cast %29 : vector<16x16xf32> to vector<1x16x16xf32>
    tpu.vector_store %arg9[%c2_17, %c0_18, %c0_19], %32 {strides = array<i32>} : memref<4x16x16xf32, #tpu.memory_space<vmem>>, vector<1x16x16xf32>,
    %33 = vector.extract_strided_slice %5 {offsets = [0, 48], sizes = [16, 16], strides = [1, 1]} : vector<16x128xf32> to vector<16x16xf32>
    %34 = vector.extract_strided_slice %5 {offsets = [0, 112], sizes = [16, 16], strides = [1, 1]} : vector<16x128xf32> to vector<16x16xf32>
    %c3 = arith.constant 3 : index
    %c0_20 = arith.constant 0 : index
    %c0_21 = arith.constant 0 : index
    %35 = vector.load %arg4[%c3, %c0_20, %c0_21] : memref<4x16x16xf32, #tpu.memory_space<vmem>>, vector<1x16x16xf32>
    %36 = vector.shape_cast %35 : vector<1x16x16xf32> to vector<16x16xf32>
    %37 = arith.mulf %33, %36 : vector<16x16xf32>
    %38 = arith.addf %37, %34 : vector<16x16xf32>
    %c3_22 = arith.constant 3 : index
    %c0_23 = arith.constant 0 : index
    %c0_24 = arith.constant 0 : index
    %39 = vector.load %arg9[%c3_22, %c0_23, %c0_24] : memref<4x16x16xf32, #tpu.memory_space<vmem>>, vector<1x16x16xf32>
    %40 = vector.shape_cast %39 : vector<1x16x16xf32> to vector<16x16xf32>
    %41 = vector.shape_cast %38 : vector<16x16xf32> to vector<1x16x16xf32>
    tpu.vector_store %arg9[%c3_22, %c0_23, %c0_24], %41 {strides = array<i32>} : memref<4x16x16xf32, #tpu.memory_space<vmem>>, vector<1x16x16xf32>,
    return
  }
  func.func @transform_0(%arg0: i32, %arg1: i32) -> (i32, i32, i32) {
    %c0_i32 = arith.constant 0 : i32
    %c0_i32_0 = arith.constant 0 : i32
    %c0_i32_1 = arith.constant 0 : i32
    return %arg0, %c0_i32, %c0_i32_0 : i32, i32, i32
  }
  func.func @transform_1(%arg0: i32, %arg1: i32) -> (i32, i32, i32) {
    %c0_i32 = arith.constant 0 : i32
    %c0_i32_0 = arith.constant 0 : i32
    %c0_i32_1 = arith.constant 0 : i32
    return %arg0, %c0_i32, %c0_i32_0 : i32, i32, i32
  }
  func.func @transform_2(%arg0: i32, %arg1: i32) -> (i32, i32, i32) {
    %c0_i32 = arith.constant 0 : i32
    %c0_i32_0 = arith.constant 0 : i32
    return %arg0, %arg1, %c0_i32 : i32, i32, i32
  }
  func.func @transform_3(%arg0: i32, %arg1: i32) -> (i32, i32) {
    %c0_i32 = arith.constant 0 : i32
    %c0_i32_0 = arith.constant 0 : i32
    %c0_i32_1 = arith.constant 0 : i32
    return %c0_i32, %c0_i32_0 : i32, i32
  }
  func.func @transform_4(%arg0: i32, %arg1: i32) -> (i32, i32) {
    %c0_i32 = arith.constant 0 : i32
    %c0_i32_0 = arith.constant 0 : i32
    %c0_i32_1 = arith.constant 0 : i32
    return %c0_i32, %c0_i32_0 : i32, i32
  }
  func.func @transform_5(%arg0: i32, %arg1: i32) -> (i32, i32) {
    %c0_i32 = arith.constant 0 : i32
    %c0_i32_0 = arith.constant 0 : i32
    return %arg1, %c0_i32 : i32, i32
  }
  func.func @transform_6(%arg0: i32, %arg1: i32) -> (i32, i32) {
    %c0_i32 = arith.constant 0 : i32
    %c0_i32_0 = arith.constant 0 : i32
    %c0_i32_1 = arith.constant 0 : i32
    return %c0_i32, %c0_i32_0 : i32, i32
  }
  func.func @transform_7(%arg0: i32, %arg1: i32) -> (i32, i32, i32) {
    %c0_i32 = arith.constant 0 : i32
    %c0_i32_0 = arith.constant 0 : i32
    return %arg0, %arg1, %c0_i32 : i32, i32, i32
  }
}

</mosaic_0001>

<bundles_post_ra>
// kernel: tpu_custom_call.1
= control target key start
LH: loop header
LB: loop body
LE: loop exit
PB: predicated region body
PF: predicated region fallthrough
CT: control target
= control target key end

     0   :  { %s4232_s0 = inlined_call_operand.hbm [shape: f32[8,8,8], index: 0, kind: input, shape index: {}]   ;;  %s4233_s1 = inlined_call_operand.hbm [shape: f32[8,8,8], index: 1, kind: input, shape index: {}]   ;;  %s4234_s2 = inlined_call_operand.hbm [shape: f32[8,16,16], index: 2, kind: input, shape index: {}]   ;;  %s4235_s3 = inlined_call_operand.hbm [shape: f32[8,8], index: 3, kind: input, shape index: {}]   ;;  %s4236_s4 = inlined_call_operand.hbm [shape: f32[8,8], index: 4, kind: input, shape index: {}]   ;;  %s4237_s5 = inlined_call_operand.hbm [shape: f32[16,8], index: 5, kind: input, shape index: {}]   ;;  %s4238_s6 = inlined_call_operand.hbm [shape: f32[8,16], index: 6, kind: input, shape index: {}]   ;;  %s4239_s7 = inlined_call_operand.hbm [shape: f32[8,16,16], index: 7, kind: output, shape index: {}]  }
   0x1   :  { %4267 = sst [smem:[#allocation28_spill]] %s4233_s1 }
   0x2   :  { %4268 = sst [smem:[#allocation29_spill]] %s4235_s3 }
   0x3   :  { %4269 = sst [smem:[#allocation30_spill]] %s4237_s5 }
   0x4   :  { %4270 = sst [smem:[#allocation31_spill]] %s4239_s7 }
   0x5   :  { %12 = vsyncpa [#allocation4], 0 }
   0x6   :  { %14 = vsyncpa [#allocation4 + $0x1], 0 }
   0x7   :  { %15 = vsyncpa [#allocation7], 0 }
   0x8   :  { %17 = vsyncpa [#allocation7 + $0x1], 0 }
   0x9   :  { %18 = vsyncpa [#allocation10], 0 }
   0xa   :  { %19 = vsyncpa [#allocation13], 0 }
   0xb   :  { %20 = vsyncpa [#allocation5], 0 }
   0xc   :  { %22 = vsyncpa [#allocation5 + $0x1], 0  ;;  %s3636_s24 = smov 0   ;;  %s3638_s25 = smov 0  }
   0xd   :  { %s3640_s26 = smov 0   ;;  %s3642_s27 = smov 0  }
   0xe   :  { %s3644_s28 = smov 0   ;;  %s3646_s29 = smov 0  }
   0xf LB: > { %4271 = sst [smem:[#allocation21_spill]] %s3553_s24  ;;  %s3667_s30 = sadd.s32 4294967295, %s3573_s29   ;;  %s3573_s29 = sphi %s3646_s29, %s28_s29   ;;  %s3569_s28 = sphi %s3644_s28, %s4319_s28   ;;  %s3565_s27 = sphi %s3642_s27, %s4318_s27   ;;  %s3561_s26 = sphi %s3640_s26, %s4314_s26   ;;  %s3557_s25 = sphi %s3638_s25, %s4317_s25   ;;  %s3553_s24 = sphi %s3636_s24, %s4316_s24  }
  0x10   : > { %4272 = sst [smem:[#allocation22_spill]] %s3561_s26  ;;  %s2832_s8 = sadd.s32 4294967294, %s3573_s29  }
  0x11   : > { %4273 = sst [smem:[#allocation23_spill]] %s3573_s29  ;;  %p60_p0 = scmp.ne.s32.totalorder %s3557_s25, %s3553_s24 }
  0x12   : > { %p4240_p1 = scmp.eq.s32.totalorder %s3667_s30, 0  ;;  %p235_p3 = scmp.eq.s32.totalorder %s2832_s8, 1 }
  0x13   : > { %p2833_p5 = scmp.ge.s32.totalorder %s3573_s29, 1  ;;  %p242_p7 = scmp.lt.s32.totalorder %s3573_s29, 3 }
  0x14   : > { %p3676_p4 = por %p4240_p1, %p60_p0  ;;  %p3681_p6 = por %p235_p3, %p60_p0 }
  0x15   : > { %p3686_p8 = pnand %p2833_p5, %p242_p7  ;;  %s3575_s12 = smov [#allocation9]  }
  0x16   : > { %s4274_s9 = scalar_select %p3676_p4, 1, 0 }
  0x17   : > { %s4275_s10 = scalar_select %p3681_p6, 1, 0 }
  0x18   : > { %s4277_s11 = scalar_select %p3686_p8, 1, 0 }
  0x19   : > { %4276 = sst [smem:[#allocation24_spill]] %s4275_s10  ;;  %s255_s13 = sshll.u32 %s3575_s12, 4  ;;  %s256_s13 = int_to_ptr.vmem [resolvable:$true] %s255_s13 }
  0x1a   : > { %p3167_p10 = pneg %p3686_p8  ;;  %s3576_s14 = smov [#allocation12]  }
  0x1b   : > { %s279_s15 = sshll.u32 %s3576_s14, 4  ;;  %s4279_s3 = sld [smem:[#allocation29_spill]]  ;;  %s3699_s15 = int_to_ptr.vmem [resolvable:$true] %s279_s15 }
  0x1c   : > { %p3695_p11 = pnand %p3167_p10, %p4240_p1 }
  0x1e   : > { %s4278_s16 = scalar_select %p3695_p11, 1, 0 }
  0x1f   : > { %p3709_p13 = pneg %p3695_p11 }
  0x21   : > { %s3277_s19 = scalar_lea.hbm %s4279_s3, 128 }
  0x22   : > { %p3278_p12 = scmp.ne.s32.totalorder %s4279_s3, %s3277_s19  ;;  %p3284_p5 = scmp.lt.u32.totalorder %s3277_s19, %s4279_s3 }
  0x23   : > { %s4280_s22 = scalar_select %p3709_p13, 1, 0 }
  0x24   : > { %p3280_p0 = pnand %p3709_p13, %p3278_p12 }
  0x26   : > { %p3281_p3 = pneg %p3280_p0 }
  0x28   : > { %p3286_p7 = pnand %p3284_p5, %p3281_p3 }
  0x2a   : > { %3289 = shalt.err (!%p3286_p7)
}
  0x2b   : > { %s3290_s12 = scalar_lea.vmem %s256_s13, 128  ;;  %p3298_p2 = scmp.lt.s32.totalorder %s256_s13, %s256_s13 }
  0x2c   : > { %p3291_p10 = scmp.ne.s32.totalorder %s256_s13, %s3290_s12  ;;  %p3299_p6 = scmp.lt.s32.totalorder %s3290_s12, %s3290_s12 }
  0x2e   : > { %p3293_p9 = pnand %p3291_p10, %p3709_p13  ;;  %p3300_p4 = por %p3299_p6, %p3298_p2 }
  0x30   : > { %p3294_p1 = pneg %p3293_p9 }
  0x32   : > { %p3301_p8 = pnand %p3300_p4, %p3294_p1 }
  0x34   : > { %3304 = shalt.err (!%p3301_p8)
}
  0x35   : > { %3170 = dma.hbm_to_vmem [thread:$0]  (!%p3695_p11), %s4279_s3, 128, %s256_s13, [#allocation10]  }
  0x36   : > { %s4281_s5 = sld [smem:[#allocation30_spill]] }
  0x3c   : > { %s3305_s20 = scalar_lea.hbm %s4281_s5, 256 }
  0x3d   : > { %p3306_p9 = scmp.ne.s32.totalorder %s4281_s5, %s3305_s20  ;;  %p3312_p1 = scmp.lt.u32.totalorder %s3305_s20, %s4281_s5 }
  0x3f   : > { %p3308_p12 = pnand %p3306_p9, %p3709_p13 }
  0x41   : > { %p3309_p2 = pneg %p3308_p12 }
  0x43   : > { %p3314_p4 = pnand %p3312_p1, %p3309_p2 }
  0x45   : > { %3317 = shalt.err (!%p3314_p4)
}
  0x46   : > { %s3318_s13 = scalar_lea.vmem %s3699_s15, 256  ;;  %p3326_p3 = scmp.lt.s32.totalorder %s3699_s15, %s3699_s15 }
  0x47   : > { %p3319_p6 = scmp.ne.s32.totalorder %s3699_s15, %s3318_s13  ;;  %p3327_p5 = scmp.lt.s32.totalorder %s3318_s13, %s3318_s13 }
  0x49   : > { %p3321_p8 = pnand %p3319_p6, %p3709_p13  ;;  %p3328_p7 = por %p3327_p5, %p3326_p3 }
  0x4b   : > { %p3322_p0 = pneg %p3321_p8 }
  0x4d   : > { %p3329_p10 = pnand %p3328_p7, %p3322_p0 }
  0x4f   : > { %3332 = shalt.err (!%p3329_p10)
}
  0x50   : > { %s4243_s14 = smov 128   ;;  %s4245_s17 = smov 8  }
  0x51   : > { %3176 = dma.hbm_to_vmem [thread:$0]  (!%p3695_p11), %s4281_s5, 256, %s3699_s15, [#allocation13], %s4243_s14, %s4243_s14, %s4245_s17  }
  0x52   : > { %s40_s20 = sadd.s32 1, %s3569_s28  ;;  %s47_s21 = sadd.s32 1, %s3561_s26 }
  0x53   : > { %p42_p9 = scmp.ge.s32.totalorder %s40_s20, 2  ;;  %p54_p12 = scmp.ne.s32.totalorder %s3561_s26, %s3557_s25 }
  0x54   : > { %p55_p2 = scmp.eq.s32.totalorder %s3573_s29, 0  ;;  %p3198_p1 = scmp.lt.s32.totalorder %s3573_s29, 2 }
  0x55   : > { %s4321_s20 = smov (%p42_p9, %s40_s20), 0  ;;  %p4283_p6 = scmp.eq.s32.totalorder %s3667_s30, 1 }
  0x56   : > { %4282 = sst [smem:[#allocation25_spill]] %s4321_s20  ;;  %p56_p4 = por %p55_p2, %p54_p12 }
  0x57   : > { %p3761_p8 = por %p4283_p6, %p54_p12  ;;  %s44_s8 = ssub.s32 %s3569_s28, %s4321_s20 }
  0x58   : > { %s3768_s15 = sand.u32 1, %s3561_s26   ;;  %p45_p0 = scmp.eq.s32.totalorder %s44_s8, 0 }
  0x59   : > { %s4284_s23 = scalar_select %p3761_p8, 1, 0 }
  0x5a   : > { %s4249_s12 = sshll.u32 %s3768_s15, 5  ;;  %s4250_s13 = sshll.u32 %s3569_s28, 9 }
  0x5b   : > { %4285 = sst [smem:[#allocation26_spill]] %s4284_s23  ;;  %p3772_p3 = pnand %p3198_p1, %p56_p4 }
  0x5c   : > { %s3777_s19 = scalar_select %p45_p0, %s3561_s26, %s47_s21  }
  0x5d   : > { %s4286_s18 = scalar_select %p3772_p3, 1, 0 }
  0x5e   : > { %4287 = sst [smem:[#allocation27_spill]] %s3777_s19  ;;  %s325_s14 = sand.u32 1, %s3573_s29  }
  0x5f   : > { %s4288_s1 = sld [smem:[#allocation28_spill]]  ;;  %s329_s8 = scalar_lea.vmem [#allocation6], %s4249_s12 }
  0x60   : > { %s336_s20 = sshll.u32 %s329_s8, 4  ;;  %s3791_s10 = scalar_lea.sflag [#allocation7], %s325_s14  ;;  %s3789_s20 = int_to_ptr.vmem [resolvable:$true] %s336_s20 }
  0x61   : > { %p3797_p7 = pneg %p3772_p3 }
  0x63   : > { %s4289_s19 = scalar_select %p3797_p7, 1, 0 }
  0x65   : > { %s3785_s5 = scalar_lea.hbm %s4288_s1, %s4250_s13  ;;  %s3338_s12 = scalar_lea.hbm %s4288_s1, 1024 }
  0x66   : > { %s3333_s21 = scalar_lea.hbm %s3785_s5, 512  ;;  %p3339_p12 = scmp.lt.u32.totalorder %s3785_s5, %s4288_s1 }
  0x67   : > { %p3334_p5 = scmp.ne.s32.totalorder %s3785_s5, %s3333_s21  ;;  %p3340_p2 = scmp.lt.u32.totalorder %s3338_s12, %s3333_s21 }
  0x68   : > { %p3342_p4 = scmp.lt.u32.totalorder %s3333_s21, %s3785_s5 }
  0x69   : > { %p3336_p10 = pnand %p3797_p7, %p3334_p5  ;;  %p3341_p1 = por %p3340_p2, %p3339_p12 }
  0x6b   : > { %p3337_p9 = pneg %p3336_p10  ;;  %p3343_p6 = por %p3342_p4, %p3341_p1 }
  0x6d   : > { %p3344_p0 = pnand %p3343_p6, %p3337_p9 }
  0x6f   : > { %3347 = shalt.err (!%p3344_p0)
}
  0x70   : > { %s3348_s14 = scalar_lea.vmem %s3789_s20, 512  ;;  %s3579_s3 = smov [#allocation6]  }
  0x71   : > { %p3349_p5 = scmp.ne.s32.totalorder %s3789_s20, %s3348_s14  ;;  %s3353_s17 = sshll.u32 %s3579_s3, 4  ;;  %s3354_s17 = int_to_ptr.vmem [resolvable:$false] %s3353_s17 }
  0x72   : > { %s3355_s13 = scalar_lea.vmem %s3354_s17, 1024  ;;  %p3356_p11 = scmp.lt.s32.totalorder %s3789_s20, %s3354_s17 }
  0x73   : > { %p3351_p10 = pnand %p3349_p5, %p3797_p7  ;;  %p3357_p13 = scmp.lt.s32.totalorder %s3355_s13, %s3348_s14 }
  0x75   : > { %p3352_p8 = pneg %p3351_p10  ;;  %p3358_p12 = por %p3357_p13, %p3356_p11 }
  0x77   : > { %p3359_p2 = pnand %p3358_p12, %p3352_p8 }
  0x79   : > { %3362 = shalt.err (!%p3359_p2)
}
  0x7a   : > { %s4290_s12 = smov 8   ;;  %s4291_s21 = smov 128  }
  0x7b   : > { %3186 = dma.hbm_to_vmem [thread:$0]  (!%p3772_p3), %s3785_s5, 512, %s3789_s20, %s3791_s10, %s4291_s21, %s4291_s21, %s4290_s12  }
  0x7c   : > { %s3580_s8 = smov [#allocation11]   ;;  %s3581_s3 = smov [#allocation14]  }
  0x7d   : > { %s266_s1 = sshll.u32 %s3580_s8, 4  ;;  %s293_s26 = sshll.u32 %s3581_s3, 4  ;;  %s267_s1 = int_to_ptr.vmem [resolvable:$true] %s266_s1  ;;  %s294_s26 = int_to_ptr.vmem [resolvable:$true] %s293_s26 }
  0x7e   : > { %s3363_s13 = scalar_lea.hbm %s4236_s4, 128  ;;  %p4292_p13 = scmp.ne.s32.totalorder %s4280_s22, 0 }
  0x7f   : > { %p3364_p11 = scmp.ne.s32.totalorder %s4236_s4, %s3363_s13  ;;  %p3370_p1 = scmp.lt.u32.totalorder %s3363_s13, %s4236_s4 }
  0x81   : > { %p3366_p8 = pnand %p3364_p11, %p4292_p13 }
  0x83   : > { %p3367_p9 = pneg %p3366_p8 }
  0x85   : > { %p3372_p4 = pnand %p3370_p1, %p3367_p9 }
  0x87   : > { %3375 = shalt.err (!%p3372_p4)
}
  0x88   : > { %s3376_s5 = scalar_lea.vmem %s267_s1, 128  ;;  %p3384_p10 = scmp.lt.s32.totalorder %s267_s1, %s267_s1 }
  0x89   : > { %p3377_p6 = scmp.ne.s32.totalorder %s267_s1, %s3376_s5  ;;  %p3385_p12 = scmp.lt.s32.totalorder %s3376_s5, %s3376_s5 }
  0x8b   : > { %p3379_p0 = pnand %p3377_p6, %p4292_p13  ;;  %p3386_p2 = por %p3385_p12, %p3384_p10 }
  0x8d   : > { %p3380_p5 = pneg %p3379_p0 }
  0x8f   : > { %p3387_p3 = pnand %p3386_p2, %p3380_p5 }
  0x91   : > { %3390 = shalt.err (!%p3387_p3)
}
  0x92   : > { %p4293_p11 = scmp.ne.s32.totalorder %s4278_s16, 0  ;;  %s3391_s23 = scalar_lea.hbm %s4238_s6, 128 }
  0x93   : > { %p3392_p8 = scmp.ne.s32.totalorder %s4238_s6, %s3391_s23  ;;  %p3398_p3 = scmp.lt.u32.totalorder %s3391_s23, %s4238_s6 }
  0x94   : > { %3173 = dma.hbm_to_vmem [thread:$0]  (!%p4293_p11), %s4236_s4, 128, %s267_s1, [#allocation10]  }
  0x95   : > { %p3394_p9 = pnand %p3392_p8, %p4292_p13 }
  0x97   : > { %p3395_p1 = pneg %p3394_p9 }
  0x99   : > { %p3400_p4 = pnand %p3398_p3, %p3395_p1 }
  0x9b   : > { %3403 = shalt.err (!%p3400_p4)
}
  0x9c   : > { %s3404_s13 = scalar_lea.vmem %s294_s26, 128  ;;  %p3412_p10 = scmp.lt.s32.totalorder %s294_s26, %s294_s26 }
  0x9d   : > { %p3405_p6 = scmp.ne.s32.totalorder %s294_s26, %s3404_s13  ;;  %p3413_p12 = scmp.lt.s32.totalorder %s3404_s13, %s3404_s13 }
  0x9f   : > { %p3407_p0 = pnand %p3405_p6, %p4292_p13  ;;  %p3414_p2 = por %p3413_p12, %p3412_p10 }
  0xa1   : > { %p3408_p5 = pneg %p3407_p0 }
  0xa3   : > { %p3415_p7 = pnand %p3414_p2, %p3408_p5 }
  0xa5   : > { %3418 = shalt.err (!%p3415_p7)
}
  0xa6   : > { %3179 = dma.hbm_to_vmem [thread:$0]  (!%p4293_p11), %s4238_s6, 128, %s294_s26, [#allocation13]  }
  0xa7   : > { %s4294_s24 = sshll.u32 %s3569_s28, 9  ;;  %s4295_s20 = sshll.u32 %s3768_s15, 5 }
  0xa8   : > { %s3865_s7 = scalar_lea.hbm %s4232_s0, %s4294_s24  ;;  %s308_s16 = scalar_lea.vmem [#allocation3], %s4295_s20 }
  0xa9   : > { %s315_s23 = sshll.u32 %s308_s16, 4  ;;  %s2845_s8 = sshll.u32 %s3768_s15, 6  ;;  %s3870_s23 = int_to_ptr.vmem [resolvable:$true] %s315_s23 }
  0xaa   : > { %s305_s3 = scalar_lea.sflag [#allocation4], %s3768_s15  ;;  %s3419_s17 = scalar_lea.hbm %s3865_s7, 512 }
  0xab   : > { %p3420_p7 = scmp.ne.s32.totalorder %s3865_s7, %s3419_s17  ;;  %p4296_p13 = scmp.ne.s32.totalorder %s4289_s19, 0 }
  0xac   : > { %s3424_s13 = scalar_lea.hbm %s4232_s0, 1024  ;;  %p3425_p9 = scmp.lt.u32.totalorder %s3865_s7, %s4232_s0 }
  0xad   : > { %p3422_p11 = pnand %p3420_p7, %p4296_p13  ;;  %p3426_p1 = scmp.lt.u32.totalorder %s3424_s13, %s3419_s17 }
  0xae   : > { %p3428_p4 = scmp.lt.u32.totalorder %s3419_s17, %s3865_s7 }
  0xaf   : > { %p3423_p8 = pneg %p3422_p11  ;;  %p3427_p3 = por %p3426_p1, %p3425_p9 }
  0xb1   : > { %p3429_p6 = por %p3428_p4, %p3427_p3 }
  0xb3   : > { %p3430_p0 = pnand %p3429_p6, %p3423_p8 }
  0xb5   : > { %3433 = shalt.err (!%p3430_p0)
}
  0xb6   : > { %s3434_s24 = scalar_lea.vmem %s3870_s23, 512  ;;  %s3582_s22 = smov [#allocation3]  }
  0xb7   : > { %p3435_p5 = scmp.ne.s32.totalorder %s3870_s23, %s3434_s24  ;;  %s3439_s29 = sshll.u32 %s3582_s22, 4  ;;  %s3440_s29 = int_to_ptr.vmem [resolvable:$false] %s3439_s29 }
  0xb8   : > { %s3441_s20 = scalar_lea.vmem %s3440_s29, 1024  ;;  %p3442_p2 = scmp.lt.s32.totalorder %s3870_s23, %s3440_s29 }
  0xb9   : > { %p3437_p10 = pnand %p3435_p5, %p4296_p13  ;;  %p3443_p7 = scmp.lt.s32.totalorder %s3441_s20, %s3434_s24 }
  0xbb   : > { %p3438_p12 = pneg %p3437_p10  ;;  %p3444_p11 = por %p3443_p7, %p3442_p2 }
  0xbd   : > { %p3445_p9 = pnand %p3444_p11, %p3438_p12 }
  0xbf   : > { %3448 = shalt.err (!%p3445_p9)
}
  0xc0   : > { %p4297_p8 = scmp.ne.s32.totalorder %s4286_s18, 0  ;;  %s2921_s16 = sshll.u32 %s3569_s28, 10 }
  0xc1   : > { %s350_s17 = scalar_lea.vmem [#allocation8], %s2845_s8  ;;  %s3905_s1 = scalar_lea.hbm %s4234_s2, %s2921_s16 }
  0xc2   : > { %3183 = dma.hbm_to_vmem [thread:$0]  (!%p4297_p8), %s3865_s7, 512, %s3870_s23, %s305_s3, %s4291_s21, %s4291_s21, %s4290_s12  }
  0xc3   : > { %s360_s26 = sshll.u32 %s350_s17, 4  ;;  %s3449_s5 = scalar_lea.hbm %s3905_s1, 1024  ;;  %s3907_s26 = int_to_ptr.vmem [resolvable:$true] %s360_s26 }
  0xc4   : > { %p3450_p1 = scmp.ne.s32.totalorder %s3905_s1, %s3449_s5  ;;  %s3454_s23 = scalar_lea.hbm %s4234_s2, 2048 }
  0xc5   : > { %p3455_p6 = scmp.lt.u32.totalorder %s3905_s1, %s4234_s2  ;;  %p3456_p0 = scmp.lt.u32.totalorder %s3454_s23, %s3449_s5 }
  0xc6   : > { %p3452_p3 = pnand %p3450_p1, %p4296_p13  ;;  %p3458_p10 = scmp.lt.u32.totalorder %s3449_s5, %s3905_s1 }
  0xc7   : > { %p3457_p5 = por %p3456_p0, %p3455_p6 }
  0xc8   : > { %p3453_p4 = pneg %p3452_p3 }
  0xc9   : > { %p3459_p12 = por %p3458_p10, %p3457_p5 }
  0xcb   : > { %p3460_p2 = pnand %p3459_p12, %p3453_p4 }
  0xcd   : > { %3463 = shalt.err (!%p3460_p2)
}
  0xce   : > { %s3464_s24 = scalar_lea.vmem %s3907_s26, 1024  ;;  %s3583_s22 = smov [#allocation8]  }
  0xcf   : > { %p3465_p7 = scmp.ne.s32.totalorder %s3907_s26, %s3464_s24  ;;  %s3469_s29 = sshll.u32 %s3583_s22, 4  ;;  %s3470_s29 = int_to_ptr.vmem [resolvable:$false] %s3469_s29 }
  0xd0   : > { %s3471_s20 = scalar_lea.vmem %s3470_s29, 2048  ;;  %p3472_p1 = scmp.lt.s32.totalorder %s3907_s26, %s3470_s29 }
  0xd1   : > { %p3467_p11 = pnand %p3465_p7, %p4296_p13  ;;  %p3473_p3 = scmp.lt.s32.totalorder %s3471_s20, %s3464_s24 }
  0xd3   : > { %p3468_p9 = pneg %p3467_p11  ;;  %p3474_p6 = por %p3473_p3, %p3472_p1 }
  0xd5   : > { %p3475_p0 = pnand %p3474_p6, %p3468_p9 }
  0xd7   : > { %3478 = shalt.err (!%p3475_p0)
}
  0xd8   : > { %3189 = dma.hbm_to_vmem [thread:$0]  (!%p4297_p8), %s3905_s1, 1024, %s3907_s26, %s3791_s10, %s4291_s21, %s4291_s21, %s4290_s12  }
  0xd9   : > { %p4298_p13 = scmp.ne.s32.totalorder %s4277_s11, 0 }
  0xda   : > { %s3937_s19 = sand.u32 (!%p4298_p13), 1, %s3557_s25   ;;  %p4299_p4 = scmp.ne.s32.totalorder (!%p4298_p13), %s4274_s9, 0 }
  0xdb   : > { %372 = sbr.rel (%p4298_p13) target bundleno = 1541 (0x605), region = 48  ;;  %s2850_s16 = sshll.u32 (!%p4298_p13), %s3937_s19, 5 }
  0xdc   : > { %s375_s17 = scalar_lea.sflag (!%p4298_p13), [#allocation4], %s3937_s19  ;;  %s3941_s14 = scalar_lea.vmem (!%p4298_p13), [#allocation3], %s2850_s16 }
  0xe2   : > { %3532 = dma.done.wait (%p4299_p4), %s375_s17, 512  }
  0xe3   : > { %3534 = vsyncadd (%p4299_p4), %s375_s17, 4294966784  ;;  %s383_s10 = sand.u32 1, %s3667_s30   ;;  %s387_s18 = scalar_lea.vmem [#allocation6], %s2850_s16 }
  0xe4   : > { %s384_s11 = scalar_lea.sflag [#allocation7], %s383_s10 }
  0xe5   : > { %3536 = dma.done.wait (%p4299_p4), %s384_s11, 1536  }
  0xe6   : > { %3538 = vsyncadd (%p4299_p4), %s384_s11, 4294965760  ;;  %s2852_s12 = sshll.u32 %s3937_s19, 6  ;;  %p4300_p8 = scmp.eq.s32.totalorder %s3667_s30, 0 }
  0xe7   : > { %s3955_s21 = scalar_lea.vmem [#allocation8], %s2852_s12 }
  0xe8   : > { %3540 = dma.done.wait (%p4300_p8), [#allocation10], 256   ;;  %p4301_p5 = pmov %p4300_p8 }
  0xea   : > { %3542 = vsyncadd (%p4301_p5), [#allocation10], 4294967040  ;;  %p4302_p10 = pmov %p4301_p5 }
  0xeb   : > { %p4303_p12 = pmov %p4301_p5 }
  0xec   : > { %3544 = dma.done.wait (%p4302_p10), [#allocation13], 384  }
  0xed   : > { %3546 = vsyncadd (%p4303_p12), [#allocation13], 4294966912  ;;  %vm481_vm0 = vcmask 64512   ;;  %v480_v0 = vld [vmem:[#allocation11] sm:$0xff]  ;;  %v464_v1 = vld [vmem:[%s387_s18] sm:$0xff]  ;;  %v3584_v17 = vmov 0.0  }
  0xee   : > { %v465_v2 = vld [vmem:[%s387_s18 + $0x8] sm:$0xff]  ;;  %2992 = vmatprep.subr.mxu0 %v480_v0  ;;  %2994 = vmatprep.mubr.msk.f32.mxu0 %vm481_vm0, %v464_v1  ;;  %v466_v3 = vld [vmem:[%s387_s18 + $0x10] sm:$0xff]  ;;  %v467_v4 = vld [vmem:[%s387_s18 + $0x18] sm:$0xff]  ;;  %v476_v13 = vmul.f32 %v464_v1, %v464_v1  ;;  %vm3585_vm1 = vmmov 0   ;;  %vm1909_vm2 = vcmask 130048   ;;  %s3586_s30 = smov 64  }
  0xef   : > { %2993 = vmatpush3.msra.mxu0 %v480_v0  ;;  %v468_v5 = vld [vmem:[%s3941_s14] sm:$0xff]  ;;  %v469_v6 = vld [vmem:[%s3941_s14 + $0x8] sm:$0xff]  ;;  %v470_v7 = vld [vmem:[%s3941_s14 + $0x10] sm:$0xff]  ;;  %v477_v14 = vmul.f32 %v465_v2, %v465_v2  ;;  %v478_v15 = vmul.f32 %v466_v3, %v466_v3  ;;  %v479_v16 = vmul.f32 %v467_v4, %v467_v4  ;;  %3018 = vmatprep.subr.mxu1 %v3584_v17  ;;  %s3587_s9 = smov 16   ;;  %s3588_s26 = smov 80   ;;  %vm1988_vm3 = vcmask 654848  }
  0xf0   : > { %2995 = vmatmul.mubr.msk.f32.vlgmr.msra.gmra.mrb[0].mxu0 %vm481_vm0, %v465_v2  ;;  %v472_v8 = vmul.f32 %v468_v5, %v464_v1  ;;  %v471_v9 = vld [vmem:[%s3941_s14 + $0x18] sm:$0xff]  ;;  %v473_v10 = vmul.f32 %v469_v6, %v465_v2  ;;  %v474_v11 = vmul.f32 %v470_v7, %v466_v3  ;;  %3058 = vmatprep.subr.mxu0 %v3584_v17  ;;  %v3991_v19 = vld [vmem:[#allocation9] sm:$0xff]  ;;  %s3589_s13 = smov 96   ;;  %s3590_s1 = smov 32   ;;  %vm2067_vm4 = vcmask 261248  }
  0xf1   : > { %2997 = vmatprep.mubr.msk.f32.mxu0 %vm481_vm0, %v466_v3  ;;  %v475_v12 = vmul.f32 %v471_v9, %v467_v4  ;;  %3020 = vmatprep.mubr.msk.f32.mxu1 %vm3585_vm1, %v3584_v17  ;;  %v4073_v35 = vld [vmem:[#allocation14] sm:$0xff]  ;;  %s3591_s5 = smov 112   ;;  %s3592_s7 = smov 48   ;;  %vm2146_vm5 = vcmask 786048   ;;  %vm2225_vm6 = vcmask 392448   ;;  %vm2304_vm7 = vcmask 917248  }
  0xf2   : > { %vm2383_vm8 = vcmask 523648   ;;  %vm2462_vm9 = vcmask 1048448   ;;  %s4152_s15 = scalar_lea.vmem [#allocation15], %s2852_s12  ;;  %s4304_s23 = sld [smem:[#allocation26_spill]] }
  0xf3   : > { %s2923_s8 = sshll.u32 %s3565_s27, 10  ;;  %s2661_s3 = sshll.u32 %s4152_s15, 4  ;;  %s4179_s3 = int_to_ptr.vmem [resolvable:$true] %s2661_s3 }
  0xf4   : > { %2998 = vmatmul.mubr.msk.f32.gmra.mrb[2].mxu0 %vm481_vm0, %v467_v4  ;;  %s4305_s29 = sld [smem:[#allocation31_spill]]  ;;  %s2645_s27 = scalar_lea.sflag [#allocation5], %s3937_s19 }
  0xf5   : > { %3000 = vmatprep.mubr.msk.f32.mxu0 %vm481_vm0, %v468_v5  ;;  %s3479_s17 = scalar_lea.vmem %s4179_s3, 1024  ;;  %s3593_s14 = smov [#allocation15]  }
  0xf6   : > { %p3480_p2 = scmp.ne.s32.totalorder %s4179_s3, %s3479_s17  ;;  %s3483_s10 = sshll.u32 %s3593_s14, 4  ;;  %s3484_s10 = int_to_ptr.vmem [resolvable:$false] %s3483_s10 }
  0xf7   : > { %s3485_s11 = scalar_lea.vmem %s3484_s10, 2048  ;;  %p3486_p1 = scmp.lt.s32.totalorder %s4179_s3, %s3484_s10 }
  0xf8   : > { %3001 = vmatmul.mubr.msk.f32.gmra.mrb[4].mxu0 %vm481_vm0, %v469_v6  ;;  %p4307_p7 = scmp.ne.s32.totalorder %s4304_s23, 0  ;;  %p3487_p3 = scmp.lt.s32.totalorder %s3485_s11, %s3479_s17 }
  0xf9   : > { %3003 = vmatprep.mubr.msk.f32.mxu0 %vm481_vm0, %v470_v7 }
  0xfa   : > { %s4306_s20 = smov %s4305_s29  ;;  %s4177_s16 = scalar_lea.hbm %s4305_s29, %s2923_s8 }
  0xfb   : > { %p3481_p11 = pnand %p3480_p2, %p4307_p7  ;;  %p3488_p6 = por %p3487_p3, %p3486_p1 }
  0xfc   : > { %3004 = vmatmul.mubr.msk.f32.gmra.mrb[6].mxu0 %vm481_vm0, %v471_v9 }
  0xfd   : > { %3006 = vmatprep.mubr.msk.f32.mxu0 %vm481_vm0, %v472_v8  ;;  %p3482_p9 = pneg %p3481_p11 }
  0xff   : > { %p3489_p0 = pnand %p3488_p6, %p3482_p9 }
 0x100   : > { %3007 = vmatmul.mubr.msk.f32.gmra.mrb[8].mxu0 %vm481_vm0, %v473_v10 }
 0x101   : > { %3009 = vmatprep.mubr.msk.f32.mxu0 %vm481_vm0, %v474_v11 }
 0x104   : > { %3010 = vmatmul.mubr.msk.f32.gmra.mrb[10].mxu0 %vm481_vm0, %v475_v12 }
 0x105   : > { %3012 = vmatprep.mubr.msk.f32.mxu0 %vm481_vm0, %v476_v13 }
 0x108   : > { %3013 = vmatmul.mubr.msk.f32.gmra.mrb[12].mxu0 %vm481_vm0, %v477_v14 }
 0x109   : > { %3015 = vmatprep.mubr.msk.f32.mxu0 %vm481_vm0, %v478_v15 }
 0x10c   : > { %3016 = vmatmul.mubr.msk.f32.gmra.mrb[14].mxu0 %vm481_vm0, %v479_v16 }
 0x10d   : > { %3060 = vmatprep.mubr.msk.f32.mxu0 %vm3585_vm1, %v3584_v17 }
 0x1c3   : > { %v2996_v18 = vpop.f32.mrb[0].mxu0 }
 0x1c4   : > { %v596_v20 = vpop.f32.mrb[1].mxu0 }
 0x1c5   : > { %3019 = vmatpush3.msra.mxu1 %v596_v20 }
 0x1c6   : > { %3021 = vmatmul.mubr.msk.f32.vlgmr.msra.gmra.mrb[0].mxu1 %vm481_vm0, %v3991_v19  ;;  %3023 = vmatprep.subr.mxu1 %v3584_v17 }
 0x1c7   : > { %v2999_v21 = vpop.f32.mrb[2].mxu0  ;;  %3024 = vmatpush3.msra.mxu1 %v2996_v18  ;;  %3025 = vmatprep.mubr.msk.f32.mxu1 %vm3585_vm1, %v3584_v17 }
 0x1c8   : > { %v606_v22 = vpop.f32.mrb[3].mxu0  ;;  %3028 = vmatprep.subr.mxu1 %v3584_v17 }
 0x1ca   : > { %3026 = vmatmul.mubr.msk.f32.vlgmr.msra.gmra.mrb[2].mxu1 %vm481_vm0, %v3991_v19 }
 0x1cb   : > { %3029 = vmatpush3.msra.mxu1 %v606_v22  ;;  %v3002_v23 = vpop.f32.mrb[4].mxu0  ;;  %3030 = vmatprep.mubr.msk.f32.mxu1 %vm3585_vm1, %v3584_v17 }
 0x1cc   : > { %v616_v24 = vpop.f32.mrb[5].mxu0  ;;  %3033 = vmatprep.subr.mxu1 %v3584_v17 }
 0x1ce   : > { %3031 = vmatmul.mubr.msk.f32.vlgmr.msra.gmra.mrb[4].mxu1 %vm481_vm0, %v3991_v19 }
 0x1cf   : > { %3034 = vmatpush3.msra.mxu1 %v2999_v21  ;;  %v3005_v25 = vpop.f32.mrb[6].mxu0  ;;  %3035 = vmatprep.mubr.msk.f32.mxu1 %vm3585_vm1, %v3584_v17 }
 0x1d0   : > { %v626_v26 = vpop.f32.mrb[7].mxu0  ;;  %3038 = vmatprep.subr.mxu1 %v3584_v17 }
 0x1d2   : > { %3036 = vmatmul.mubr.msk.f32.vlgmr.msra.gmra.mrb[6].mxu1 %vm481_vm0, %v3991_v19 }
 0x1d3   : > { %3039 = vmatpush3.msra.mxu1 %v616_v24  ;;  %v3008_v27 = vpop.f32.mrb[8].mxu0  ;;  %3040 = vmatprep.mubr.msk.f32.mxu1 %vm3585_vm1, %v3584_v17 }
 0x1d4   : > { %v636_v28 = vpop.f32.mrb[9].mxu0  ;;  %3043 = vmatprep.subr.mxu1 %v3584_v17 }
 0x1d5   : > { %3059 = vmatpush3.msra.mxu0 %v636_v28 }
 0x1d6   : > { %3041 = vmatmul.mubr.msk.f32.vlgmr.msra.gmra.mrb[8].mxu1 %vm481_vm0, %v3991_v19  ;;  %3061 = vmatmul.mubr.msk.f32.vlgmr.msra.gmra.mrb[16].mxu0 %vm481_vm0, %v3991_v19 }
 0x1d7   : > { %3044 = vmatpush3.msra.mxu1 %v3002_v23  ;;  %v3011_v29 = vpop.f32.mrb[10].mxu0  ;;  %3068 = vmatprep.subr.mxu0 %v3584_v17 }
 0x1d8   : > { %v646_v30 = vpop.f32.mrb[11].mxu0  ;;  %3045 = vmatprep.mubr.msk.f32.mxu1 %vm3585_vm1, %v3584_v17  ;;  %3048 = vmatprep.subr.mxu1 %v3584_v17 }
 0x1d9   : > { %3069 = vmatpush3.msra.mxu0 %v646_v30  ;;  %3070 = vmatprep.mubr.msk.f32.mxu0 %vm3585_vm1, %v3584_v17 }
 0x1da   : > { %3046 = vmatmul.mubr.msk.f32.vlgmr.msra.gmra.mrb[10].mxu1 %vm481_vm0, %v3991_v19  ;;  %3071 = vmatmul.mubr.msk.f32.vlgmr.msra.gmra.mrb[18].mxu0 %vm481_vm0, %v3991_v19 }
 0x1db   : > { %3049 = vmatpush3.msra.mxu1 %v626_v26  ;;  %v3014_v31 = vpop.f32.mrb[12].mxu0  ;;  %3078 = vmatprep.subr.mxu0 %v3584_v17 }
 0x1dc   : > { %v656_v32 = vpop.f32.mrb[13].mxu0  ;;  %3050 = vmatprep.mubr.msk.f32.mxu1 %vm3585_vm1, %v3584_v17  ;;  %3053 = vmatprep.subr.mxu1 %v3584_v17 }
 0x1dd   : > { %3079 = vmatpush3.msra.mxu0 %v656_v32  ;;  %3080 = vmatprep.mubr.msk.f32.mxu0 %vm3585_vm1, %v3584_v17 }
 0x1de   : > { %3051 = vmatmul.mubr.msk.f32.vlgmr.msra.gmra.mrb[12].mxu1 %vm481_vm0, %v3991_v19  ;;  %3081 = vmatmul.mubr.msk.f32.vlgmr.msra.gmra.mrb[20].mxu0 %vm481_vm0, %v3991_v19 }
 0x1df   : > { %3054 = vmatpush3.msra.mxu1 %v3005_v25  ;;  %v3017_v33 = vpop.f32.mrb[14].mxu0  ;;  %3088 = vmatprep.subr.mxu0 %v3584_v17 }
 0x1e0   : > { %v666_v34 = vpop.f32.mrb[15].mxu0  ;;  %3055 = vmatprep.mubr.msk.f32.mxu1 %vm3585_vm1, %v3584_v17  ;;  %3063 = vmatprep.subr.mxu1 %v3584_v17 }
 0x1e1   : > { %3089 = vmatpush3.msra.mxu0 %v666_v34  ;;  %3090 = vmatprep.mubr.msk.f32.mxu0 %vm3585_vm1, %v3584_v17 }
 0x1e2   : > { %3056 = vmatmul.mubr.msk.f32.vlgmr.msra.gmra.mrb[14].mxu1 %vm481_vm0, %v3991_v19  ;;  %3091 = vmatmul.mubr.msk.f32.vlgmr.msra.gmra.mrb[22].mxu0 %vm481_vm0, %v3991_v19 }
 0x1e3   : > { %3064 = vmatpush3.msra.mxu1 %v3008_v27  ;;  %3065 = vmatprep.mubr.msk.f32.mxu1 %vm3585_vm1, %v3584_v17 }
 0x1e4   : > { %3073 = vmatprep.subr.mxu1 %v3584_v17  ;;  %3098 = vmatprep.subr.mxu0 %v3584_v17 }
 0x1e5   : > { %3100 = vmatprep.mubr.msk.f32.mxu0 %vm3585_vm1, %v3584_v17  ;;  %3099 = vmatpush3.msra.mxu0 %v4073_v35 }
 0x1e6   : > { %3066 = vmatmul.mubr.msk.f32.vlgmr.msra.gmra.mrb[16].mxu1 %vm481_vm0, %v3991_v19  ;;  %3108 = vmatprep.subr.mxu0 %v3584_v17 }
 0x1e7   : > { %3074 = vmatpush3.msra.mxu1 %v3011_v29  ;;  %3075 = vmatprep.mubr.msk.f32.mxu1 %vm3585_vm1, %v3584_v17 }
 0x1e8   : > { %3083 = vmatprep.subr.mxu1 %v3584_v17 }
 0x1ea   : > { %3076 = vmatmul.mubr.msk.f32.vlgmr.msra.gmra.mrb[18].mxu1 %vm481_vm0, %v3991_v19 }
 0x1eb   : > { %3084 = vmatpush3.msra.mxu1 %v3014_v31  ;;  %3085 = vmatprep.mubr.msk.f32.mxu1 %vm3585_vm1, %v3584_v17 }
 0x1ec   : > { %3093 = vmatprep.subr.mxu1 %v3584_v17 }
 0x1ee   : > { %3086 = vmatmul.mubr.msk.f32.vlgmr.msra.gmra.mrb[20].mxu1 %vm481_vm0, %v3991_v19 }
 0x1ef   : > { %3094 = vmatpush3.msra.mxu1 %v3017_v33  ;;  %3095 = vmatprep.mubr.msk.f32.mxu1 %vm3585_vm1, %v3584_v17 }
 0x1f0   : > { %3103 = vmatprep.subr.mxu1 %v3584_v17 }
 0x1f2   : > { %3096 = vmatmul.mubr.msk.f32.vlgmr.msra.gmra.mrb[22].mxu1 %vm481_vm0, %v3991_v19 }
 0x1f3   : > { %3105 = vmatprep.mubr.msk.f32.mxu1 %vm3585_vm1, %v3584_v17  ;;  %3104 = vmatpush3.msra.mxu1 %v4073_v35 }
 0x1f4   : > { %3113 = vmatprep.subr.mxu1 %v3584_v17 }
 0x299   : > { %v745_v36 = vpop.f32.mrb[0].mxu1 }
 0x29a   : > { %v3022_v37 = vpop.f32.mrb[1].mxu1  ;;  %v1807_v55 = vmul.f32 %v745_v36, %v745_v36 }
 0x29d   : > { %v4079_v38 = vpop.f32.mrb[2].mxu1 }
 0x29e   : > { %v3027_v39 = vpop.f32.mrb[3].mxu1  ;;  %v1808_v15 = vmul.f32 %v4079_v38, %v4079_v38 }
 0x2a1   : > { %v885_v40 = vpop.f32.mrb[4].mxu1 }
 0x2a2   : > { %v3032_v41 = vpop.f32.mrb[5].mxu1  ;;  %v1809_v0 = vmul.f32 %v885_v40, %v885_v40 }
 0x2a5   : > { %v4081_v42 = vpop.f32.mrb[6].mxu1 }
 0x2a6   : > { %v3037_v43 = vpop.f32.mrb[7].mxu1  ;;  %v1810_v24 = vmul.f32 %v4081_v42, %v4081_v42 }
 0x2a9   : > { %v1025_v44 = vpop.f32.mrb[8].mxu1  ;;  %v1305_v45 = vpop.f32.mrb[16].mxu0 }
 0x2aa   : > { %v1799_v46 = vmul.f32 %v1025_v44, %v745_v36  ;;  %v3042_v47 = vpop.f32.mrb[9].mxu1  ;;  %v3062_v48 = vpop.f32.mrb[17].mxu0 }
 0x2ac   : > { %v1803_v49 = vsub.f32 %v1305_v45, %v1799_v46 }
 0x2ad   : > { %v4083_v50 = vpop.f32.mrb[10].mxu1  ;;  %v1445_v51 = vpop.f32.mrb[18].mxu0 }
 0x2ae   : > { %v1800_v52 = vmul.f32 %v4083_v50, %v4079_v38  ;;  %v3047_v53 = vpop.f32.mrb[11].mxu1  ;;  %v3072_v54 = vpop.f32.mrb[19].mxu0 }
 0x2af   : > { %v2464_v54 = vld [vmem:[#allocation12] sm:$0xff] }
 0x2b1   : > { %v4087_v56 = vpop.f32.mrb[12].mxu1  ;;  %v1585_v57 = vpop.f32.mrb[20].mxu0 }
 0x2b2   : > { %v1801_v58 = vmul.f32 %v4087_v56, %v885_v40  ;;  %v1811_v59 = vsub.f32 %v1585_v57, %v1807_v55  ;;  %v3052_v60 = vpop.f32.mrb[13].mxu1  ;;  %v3082_v61 = vpop.f32.mrb[21].mxu0  ;;  %v2901_v57 = vld [vmem:[%s3955_s21 + $0x18] sm:$0xff] }
 0x2b3   : > { %v2904_v60 = vld [vmem:[%s3955_s21 + $0x20] sm:$0xff]  ;;  %v2909_v61 = vld [vmem:[%s3955_s21 + $0x38] sm:$0xff] }
 0x2b4   : > { %v1805_v62 = vsub.f32 %v1445_v51, %v1801_v58  ;;  %v1815_v63 = vadd.f32 0.01, %v1811_v59  ;;  %v2900_v58 = vld [vmem:[%s3955_s21 + $0x10] sm:$0xff]  ;;  %v2905_v59 = vld [vmem:[%s3955_s21 + $0x28] sm:$0xff] }
 0x2b5   : > { %v4090_v1 = vpop.f32.mrb[14].mxu1  ;;  %v1725_v2 = vpop.f32.mrb[22].mxu0 }
 0x2b6   : > { %3269 = vrcp.f32 %v1815_v63  ;;  %v1802_v3 = vmul.f32 %v4090_v1, %v4081_v42  ;;  %v1813_v4 = vsub.f32 %v1725_v2, %v1809_v0  ;;  %v3057_v5 = vpop.f32.mrb[15].mxu1  ;;  %v3092_v6 = vpop.f32.mrb[23].mxu0 }
 0x2b8   : > { %v1817_v7 = vadd.f32 0.01, %v1813_v4 }
 0x2b9   : > { %v1375_v8 = vpop.f32.mrb[16].mxu1 }
 0x2ba   : > { %3271 = vrcp.f32 %v1817_v7  ;;  %v1804_v9 = vsub.f32 %v1375_v8, %v1800_v52  ;;  %v3067_v10 = vpop.f32.mrb[17].mxu1  ;;  %v2465_v7 = vld [vmem:[#allocation12 + $0x8] sm:$0xff] }
 0x2bd   : > { %v1515_v11 = vpop.f32.mrb[18].mxu1 }
 0x2be   : > { %v1806_v12 = vsub.f32 %v1515_v11, %v1802_v3  ;;  %v3077_v13 = vpop.f32.mrb[19].mxu1 }
 0x2c0   : > { %v3270_v14 = vpop.eup %3269 }
 0x2c1   : > { %v1655_v16 = vpop.f32.mrb[20].mxu1  ;;  %v1820_v18 = vmul.f32 %v3270_v14, %v1803_v49 }
 0x2c2   : > { %v1812_v19 = vsub.f32 %v1655_v16, %v1808_v15  ;;  %v3087_v20 = vpop.f32.mrb[21].mxu1  ;;  %v2550_v15 = vld [vmem:[%s3955_s21 + $0x8] sm:$0xff]  ;;  %v2549_v16 = vld [vmem:[%s3955_s21] sm:$0xff] }
 0x2c3   : > { %3101 = vmatmul.mubr.msk.f32.vlgmr.msra.gmra.mrb[24].mxu0 %vm481_vm0, %v1820_v18  ;;  %v1827_v21 = vmul.f32 %v1820_v18, %v745_v36 }
 0x2c4   : > { %v3272_v22 = vpop.eup %3271  ;;  %v1816_v23 = vadd.f32 0.01, %v1812_v19  ;;  %3109 = vmatpush3.msra.mxu0 %v4073_v35  ;;  %3110 = vmatprep.mubr.msk.f32.mxu0 %vm3585_vm1, %v3584_v17 }
 0x2c5   : > { %v1795_v25 = vpop.f32.mrb[22].mxu1  ;;  %v1831_v26 = vsub.f32 %v1025_v44, %v1827_v21  ;;  %3118 = vmatprep.subr.mxu0 %v3584_v17  ;;  %v1824_v27 = vmul.f32 %v3272_v22, %v1805_v62  ;;  %v2908_v62 = vld [vmem:[%s3955_s21 + $0x30] sm:$0xff] }
 0x2c6   : > { %3273 = vrcp.f32 %v1816_v23  ;;  %v1814_v28 = vsub.f32 %v1795_v25, %v1810_v24  ;;  %v3097_v29 = vpop.f32.mrb[23].mxu1 }
 0x2c7   : > { %3106 = vmatmul.mubr.msk.f32.vlgmr.msra.gmra.mrb[24].mxu1 %vm481_vm0, %v1831_v26  ;;  %v1829_v30 = vmul.f32 %v1824_v27, %v885_v40 }
 0x2c8   : > { %v1818_v31 = vadd.f32 0.01, %v1814_v28  ;;  %3114 = vmatpush3.msra.mxu1 %v4073_v35  ;;  %3115 = vmatprep.mubr.msk.f32.mxu1 %vm3585_vm1, %v3584_v17 }
 0x2c9   : > { %3123 = vmatprep.subr.mxu1 %v3584_v17  ;;  %v1833_v32 = vsub.f32 %v4087_v56, %v1829_v30 }
 0x2ca   : > { %3275 = vrcp.f32 %v1818_v31 }
 0x2d0   : > { %v3274_v33 = vpop.eup %3273 }
 0x2d1   : > { %v1822_v34 = vmul.f32 %v3274_v33, %v1804_v9 }
 0x2d3   : > { %3111 = vmatmul.mubr.msk.f32.vlgmr.msra.gmra.mrb[26].mxu0 %vm481_vm0, %v1822_v34  ;;  %v1828_v36 = vmul.f32 %v1822_v34, %v4079_v38 }
 0x2d4   : > { %v3276_v37 = vpop.eup %3275  ;;  %3119 = vmatpush3.msra.mxu0 %v4073_v35  ;;  %3120 = vmatprep.mubr.msk.f32.mxu0 %vm3585_vm1, %v3584_v17 }
 0x2d5   : > { %v1832_v39 = vsub.f32 %v4083_v50, %v1828_v36  ;;  %3128 = vmatprep.subr.mxu0 %v3584_v17  ;;  %v1826_v40 = vmul.f32 %v3276_v37, %v1806_v12 }
 0x2d7   : > { %3116 = vmatmul.mubr.msk.f32.vlgmr.msra.gmra.mrb[26].mxu1 %vm481_vm0, %v1832_v39  ;;  %3121 = vmatmul.mubr.msk.f32.vlgmr.msra.gmra.mrb[28].mxu0 %vm481_vm0, %v1824_v27  ;;  %v1830_v41 = vmul.f32 %v1826_v40, %v4081_v42 }
 0x2d8   : > { %3124 = vmatpush3.msra.mxu1 %v4073_v35  ;;  %3125 = vmatprep.mubr.msk.f32.mxu1 %vm3585_vm1, %v3584_v17 }
 0x2d9   : > { %3129 = vmatpush3.msra.mxu0 %v4073_v35  ;;  %3130 = vmatprep.mubr.msk.f32.mxu0 %vm3585_vm1, %v3584_v17  ;;  %v1834_v38 = vsub.f32 %v4090_v1, %v1830_v41 }
 0x2da   : > { %3133 = vmatprep.subr.mxu1 %v3584_v17 }
 0x2db   : > { %3126 = vmatmul.mubr.msk.f32.vlgmr.msra.gmra.mrb[28].mxu1 %vm481_vm0, %v1833_v32  ;;  %3131 = vmatmul.mubr.msk.f32.vlgmr.msra.gmra.mrb[30].mxu0 %vm481_vm0, %v1826_v40 }
 0x2dc   : > { %3134 = vmatpush3.msra.mxu1 %v4073_v35  ;;  %3135 = vmatprep.mubr.msk.f32.mxu1 %vm3585_vm1, %v3584_v17 }
 0x2dd   : > { %3140 = vmatprep.mubr.msk.f32.mxu0 %vm481_vm0, %v2464_v54 }
 0x2df   : > { %3136 = vmatmul.mubr.msk.f32.vlgmr.msra.gmra.mrb[30].mxu1 %vm481_vm0, %v1834_v38 }
 0x396   : > { %v1905_v42 = vpop.f32.mrb[24].mxu0 }
 0x397   : > { %1910 = vst.msk [vmem:[#allocation2] sm:$0xff] %vm1909_vm2, %v1905_v42  ;;  %v3102_v43 = vpop.f32.mrb[25].mxu0 }
 0x39a   : > { %v1980_v44 = vpop.f32.mrb[24].mxu1 }
 0x39b   : > { %1985 = vrot.lane.b32.xlu0 %v1980_v44, %s3586_s30  ;;  %v3107_v45 = vpop.f32.mrb[25].mxu1 }
 0x3a6   : > { %v2059_v46 = vpop.f32.mrb[26].mxu0 }
 0x3a7   : > { %2064 = vrot.lane.b32.xlu0 %v2059_v46, %s3587_s9  ;;  %v3112_v47 = vpop.f32.mrb[27].mxu0 }
 0x3aa   : > { %v2138_v35 = vpop.f32.mrb[26].mxu1  ;;  %v2217_v48 = vpop.f32.mrb[28].mxu0 }
 0x3ab   : > { %2143 = vrot.lane.b32.xlu1 %v2138_v35, %s3588_s26  ;;  %v3117_v17 = vpop.f32.mrb[27].mxu1  ;;  %v3122_v49 = vpop.f32.mrb[29].mxu0 }
 0x3ae   : > { %v2296_v50 = vpop.f32.mrb[28].mxu1  ;;  %v2375_v51 = vpop.f32.mrb[30].mxu0 }
 0x3af   : > { %v3127_v52 = vpop.f32.mrb[29].mxu1  ;;  %2301 = vrot.lane.b32.xlu0 %v2296_v50, %s3589_s13  ;;  %2222 = vrot.lane.b32.xlu1 %v2217_v48, %s3590_s1  ;;  %v3132_v53 = vpop.f32.mrb[31].mxu0 }
 0x3b2   : > { %v2454_v55 = vpop.f32.mrb[30].mxu1 }
 0x3b3   : > { %v3137_v56 = vpop.f32.mrb[31].mxu1  ;;  %2459 = vrot.lane.b32.xlu0 %v2454_v55, %s3591_s5  ;;  %2380 = vrot.lane.b32.xlu1 %v2375_v51, %s3592_s7 }
 0x3b7   : > { %2573 = vrot.lane.b32.xlu0 %v2901_v57, %s3587_s9  ;;  %2571 = vrot.lane.b32.xlu1 %v2900_v58, %s3587_s9 }
 0x3bb   : > { %2599 = vrot.lane.b32.xlu0 %v2905_v59, %s3590_s1  ;;  %2597 = vrot.lane.b32.xlu1 %v2904_v60, %s3590_s1 }
 0x3bf   : > { %2625 = vrot.lane.b32.xlu0 %v2909_v61, %s3592_s7  ;;  %2623 = vrot.lane.b32.xlu1 %v2908_v62, %s3592_s7 }
 0x40d   : > { %v1986_v63 = vpop.permute.xlu0 %1985 }
 0x40e   : > { %1989 = vst.msk [vmem:[#allocation2] sm:$0xff] %vm1988_vm3, %v1986_v63 }
 0x419   : > { %v2065_v0 = vpop.permute.xlu0 %2064 }
 0x41a   : > { %2068 = vst.msk [vmem:[#allocation2] sm:$0xff] %vm2067_vm4, %v2065_v0 }
 0x41d   : > { %v2144_v1 = vpop.permute.xlu1 %2143 }
 0x41e   : > { %2147 = vst.msk [vmem:[#allocation2] sm:$0xff] %vm2146_vm5, %v2144_v1 }
 0x421   : > { %v2302_v2 = vpop.permute.xlu0 %2301  ;;  %v2223_v3 = vpop.permute.xlu1 %2222 }
 0x422   : > { %2226 = vst.msk [vmem:[#allocation2] sm:$0xff] %vm2225_vm6, %v2223_v3 }
 0x423   : > { %2305 = vst.msk [vmem:[#allocation2] sm:$0xff] %vm2304_vm7, %v2302_v2 }
 0x425   : > { %v2460_v4 = vpop.permute.xlu0 %2459  ;;  %v2381_v5 = vpop.permute.xlu1 %2380 }
 0x426   : > { %2384 = vst.msk [vmem:[#allocation2] sm:$0xff] %vm2383_vm8, %v2381_v5 }
 0x427   : > { %2463 = vst.msk [vmem:[#allocation2] sm:$0xff] %vm2462_vm9, %v2460_v4 }
 0x429   : > { %v2574_v10 = vpop.permute.xlu0 %2573  ;;  %v2572_v11 = vpop.permute.xlu1 %2571 }
 0x42d   : > { %v2600_v12 = vpop.permute.xlu0 %2599  ;;  %v2598_v13 = vpop.permute.xlu1 %2597 }
 0x42e   : > { %v2466_v6 = vld [vmem:[#allocation2] sm:$0xff] }
 0x42f   : > { %3138 = vmatprep.subr.mxu0 %v2466_v6 }
 0x430   : > { %3139 = vmatpush3.msra.mxu0 %v2466_v6 }
 0x431   : > { %3141 = vmatmul.mubr.msk.f32.vlgmr.msra.gmra.mrb[32].mxu0 %vm481_vm0, %v2465_v7  ;;  %v2626_v14 = vpop.permute.xlu0 %2625  ;;  %v2624_v18 = vpop.permute.xlu1 %2623 }
 0x504   : > { %v3142_v8 = vpop.f32.mrb[32].mxu0 }
 0x505   : > { %2557 = vrot.lane.b32.xlu0 %v3142_v8, %s3586_s30  ;;  %v2540_v9 = vpop.f32.mrb[33].mxu0  ;;  %v2578_v19 = vmul.f32 %v3142_v8, %v2574_v10  ;;  %v2552_v20 = vmul.f32 %v3142_v8, %v2550_v15  ;;  %v2604_v29 = vmul.f32 %v3142_v8, %v2600_v12  ;;  %v2630_v33 = vmul.f32 %v3142_v8, %v2626_v14 }
 0x506   : > { %2555 = vrot.lane.b32.xlu1 %v2540_v9, %s3586_s30  ;;  %v2551_v21 = vmul.f32 %v2549_v16, %v2540_v9  ;;  %v2577_v22 = vmul.f32 %v2572_v11, %v2540_v9  ;;  %v2603_v30 = vmul.f32 %v2598_v13, %v2540_v9  ;;  %v2629_v34 = vmul.f32 %v2624_v18, %v2540_v9 }
 0x577   : > { %v2558_v23 = vpop.permute.xlu0 %2557 }
 0x578   : > { %v2562_v24 = vadd.f32 %v2558_v23, %v2552_v20  ;;  %v2556_v25 = vpop.permute.xlu1 %2555  ;;  %v2580_v26 = vadd.f32 %v2578_v19, %v2558_v23  ;;  %v2606_v31 = vadd.f32 %v2604_v29, %v2558_v23  ;;  %v2632_v36 = vadd.f32 %v2630_v33, %v2558_v23 }
 0x579   : > { %v2561_v27 = vadd.f32 %v2556_v25, %v2551_v21  ;;  %v2579_v28 = vadd.f32 %v2577_v22, %v2556_v25  ;;  %v2605_v32 = vadd.f32 %v2603_v30, %v2556_v25  ;;  %v2631_v37 = vadd.f32 %v2629_v34, %v2556_v25 }
 0x57a   : > { %2565 = vst.msk [vmem:[%s4152_s15 + $0x8] sm:$0xff] %vm1909_vm2, %v2562_v24  ;;  %2585 = vrot.lane.b32.xlu0 %v2580_v26, %s3591_s5 }
 0x57b   : > { %2564 = vst.msk [vmem:[%s4152_s15] sm:$0xff] %vm1909_vm2, %v2561_v27  ;;  %2583 = vrot.lane.b32.xlu1 %v2579_v28, %s3591_s5 }
 0x57e   : > { %2611 = vrot.lane.b32.xlu0 %v2606_v31, %s3589_s13 }
 0x57f   : > { %2609 = vrot.lane.b32.xlu1 %v2605_v32, %s3589_s13 }
 0x582   : > { %2637 = vrot.lane.b32.xlu0 %v2632_v36, %s3588_s26 }
 0x583   : > { %2635 = vrot.lane.b32.xlu1 %v2631_v37, %s3588_s26 }
 0x5ec   : > { %v2586_v39 = vpop.permute.xlu0 %2585 }
 0x5ed   : > { %2903 = vst.msk [vmem:[%s4152_s15 + $0x18] sm:$0xff] %vm1909_vm2, %v2586_v39  ;;  %v2584_v40 = vpop.permute.xlu1 %2583 }
 0x5ee   : > { %2902 = vst.msk [vmem:[%s4152_s15 + $0x10] sm:$0xff] %vm1909_vm2, %v2584_v40 }
 0x5f0   : > { %v2612_v41 = vpop.permute.xlu0 %2611 }
 0x5f1   : > { %2907 = vst.msk [vmem:[%s4152_s15 + $0x28] sm:$0xff] %vm1909_vm2, %v2612_v41  ;;  %v2610_v38 = vpop.permute.xlu1 %2609 }
 0x5f2   : > { %2906 = vst.msk [vmem:[%s4152_s15 + $0x20] sm:$0xff] %vm1909_vm2, %v2610_v38 }
 0x5f4   : > { %v2638_v42 = vpop.permute.xlu0 %2637 }
 0x5f5   : > { %2911 = vst.msk [vmem:[%s4152_s15 + $0x38] sm:$0xff] %vm1909_vm2, %v2638_v42  ;;  %v2636_v43 = vpop.permute.xlu1 %2635 }
 0x5f6   : > { %2910 = vst.msk [vmem:[%s4152_s15 + $0x30] sm:$0xff] %vm1909_vm2, %v2636_v43 }
 0x5f7   : > { %3492 = shalt.err (!%p3489_p0)
}
 0x5f8   : > { %s3493_s18 = scalar_lea.hbm %s4177_s16, 1024  ;;  %s3497_s30 = scalar_lea.hbm %s4306_s20, 2048 }
 0x5f9   : > { %p3494_p13 = scmp.ne.s32.totalorder %s4177_s16, %s3493_s18  ;;  %p3498_p5 = scmp.lt.u32.totalorder %s4177_s16, %s4306_s20 }
 0x5fa   : > { %p3499_p10 = scmp.lt.u32.totalorder %s3497_s30, %s3493_s18  ;;  %p3501_p2 = scmp.lt.u32.totalorder %s3493_s18, %s4177_s16 }
 0x5fb   : > { %p3495_p4 = pnand %p3494_p13, %p4307_p7 }
 0x5fc   : > { %p3500_p12 = por %p3499_p10, %p3498_p5 }
 0x5fd   : > { %p3496_p8 = pneg %p3495_p4 }
 0x5fe   : > { %p3502_p11 = por %p3501_p2, %p3500_p12 }
 0x600   : > { %p3503_p9 = pnand %p3502_p11, %p3496_p8 }
 0x602   : > { %3506 = shalt.err (!%p3503_p9)
}
 0x603   : > { %s3594_s13 = smov 128   ;;  %s3595_s1 = smov 8  }
 0x604   : > { %3165 = dma.vmem_to_hbm [thread:$0]  (%p4307_p7), %s4179_s3, 1024, %s4177_s16, %s2645_s27, %s3594_s13, %s3594_s13, %s3595_s1  }
 0x605 PF: > { %s4308_s5 = sld [smem:[#allocation21_spill]]  ;;  %s4309_s7 = sld [smem:[#allocation24_spill]] }
 0x606   : > { %s4310_s15 = sld [smem:[#allocation23_spill]] }
 0x60b   : > { %s2676_s8 = sand.u32 1, %s4308_s5   ;;  %p4311_p1 = scmp.ne.s32.totalorder %s4309_s7, 0 }
 0x60c   : > { %p4312_p3 = scmp.ge.s32.totalorder %s4310_s15, 2  ;;  %s2677_s24 = scalar_lea.sflag [#allocation5], %s2676_s8 }
 0x60e   : > { %p3191_p6 = pnand %p4312_p3, %p4311_p1 }
 0x610   : > { %3548 = dma.done.wait (!%p3191_p6), %s2677_s24, 1024  }
 0x611   : > { %3550 = vsyncadd (!%p3191_p6), %s2677_s24, 4294966272  ;;  %s28_s29 = sadd.s32 1, %s4310_s15   ;;  %s4313_s22 = sld [smem:[#allocation22_spill]] }
 0x612   : > { %p25_p0 = scmp.ge.s32.totalorder %s28_s29, 4   ;;  %s4314_s26 = sld [smem:[#allocation27_spill]] }
 0x613   : > { %s4315_s19 = sld [smem:[#allocation25_spill]]  ;;  %s4316_s24 = smov %s3557_s25 }
 0x614   : > { %s4318_s27 = smov %s3569_s28  ;;  %27 = sbr.rel (!%p25_p0) target bundleno = 15 (0xf), region = 144 }
 0x617   : > { %s4317_s25 = smov %s4313_s22 }
 0x619   : > { %s4319_s28 = smov %s4315_s19 }
 0x61b   :  { %2682 = vsyncpa [#allocation4], 1 }
 0x61c   :  { %2684 = vsyncpa [#allocation4 + $0x1], 1 }
 0x61d   :  { %2685 = vsyncpa [#allocation7], 1 }
 0x61e   :  { %2687 = vsyncpa [#allocation7 + $0x1], 1 }
 0x61f   :  { %2688 = vsyncpa [#allocation10], 1 }
 0x620   :  { %2689 = vsyncpa [#allocation13], 1 }
 0x621   :  { %2690 = vsyncpa [#allocation5], 1 }
 0x622   :  { %2692 = vsyncpa [#allocation5 + $0x1], 1 }

</bundles_post_ra>
